<compile_context>
chip_gen: v5e
topology: v5e:2x2
jax: 0.10.0
libtpu: 0.0.40
codegen_flags: <defaults>
</compile_context>

<pallas_src>
import functools

import jax
import jax.numpy as jnp
from jax.experimental import pallas as pl
from jax.experimental.pallas import tpu as pltpu


def _double_conv_kernel(xs_ref, t1_ref, s1_ref, b1_ref, t2_ref, s2_ref, b2_ref,
                        o_ref, mid_ref, *, block_h):
    # xs_ref : (TH+4, W*Cin)   bf16  halo'd input slab (auto-pipelined)
    # t1_ref : (3, W*Cin,  W*Cmid) bf16  block-Toeplitz conv1 weights (per ky)
    # s1/b1  : (1, W*Cmid) f32   folded BN1 scale / bias (conv bias included)
    # t2_ref : (3, W*Cmid, W*Cout) bf16
    # s2/b2  : (1, W*Cout) f32
    # o_ref  : (TH, W*Cout) f32  output tile (lane-dense)
    # mid_ref: (TH+2, W*Cmid) bf16 VMEM conv1 intermediate (incl. conv2 row halo)
    th = block_h
    r1 = th + 2                       # conv1 rows per tile (TH + 1-row halo each side)
    t = pl.program_id(1)
    nt = pl.num_programs(1)

    xs = xs_ref[...]                  # (TH+4, W*Cin) bf16, loaded once

    # ---- conv1 + BN1 + ReLU: 3 MXU matmuls (one per ky tap).  kx taps and the
    # width zero-padding are folded into the Toeplitz weights.
    acc1 = jnp.dot(xs[0:r1, :], t1_ref[0], preferred_element_type=jnp.float32)
    acc1 += jnp.dot(xs[1:r1 + 1, :], t1_ref[1], preferred_element_type=jnp.float32)
    acc1 += jnp.dot(xs[2:r1 + 2, :], t1_ref[2], preferred_element_type=jnp.float32)
    y1 = jnp.maximum(acc1 * s1_ref[...] + b1_ref[...], 0.0)

    # Dense, aligned, full-ref bf16 store of the intermediate.
    mid_ref[...] = y1.astype(mid_ref.dtype)

    # Conv1 halo rows that fall outside the image are conv2's zero padding.
    # Only the first / last row tile has such a row -> guard with pl.when
    # instead of a full-tile iota+select.
    zero_row = jnp.zeros((1, mid_ref.shape[1]), mid_ref.dtype)

    @pl.when(t == 0)
    def _():
        mid_ref[0:1, :] = zero_row

    @pl.when(t == nt - 1)
    def _():
        mid_ref[r1 - 1:r1, :] = zero_row

    # ---- conv2 + BN2 + ReLU: same structure (K=W*Cmid, N=W*Cout).
    mid = mid_ref[...]                # (TH+2, W*Cmid) bf16
    acc2 = jnp.dot(mid[0:th, :], t2_ref[0], preferred_element_type=jnp.float32)
    acc2 += jnp.dot(mid[1:th + 1, :], t2_ref[1], preferred_element_type=jnp.float32)
    acc2 += jnp.dot(mid[2:th + 2, :], t2_ref[2], preferred_element_type=jnp.float32)
    y2 = jnp.maximum(acc2 * s2_ref[...] + b2_ref[...], 0.0)
    o_ref[...] = y2.astype(o_ref.dtype)


def _fold_bn(conv_bias, gamma, beta, running_mean, running_var, eps=1e-5):
    scale = gamma * jax.lax.rsqrt(running_var + eps)
    bias = (conv_bias - running_mean) * scale + beta
    return scale, bias


def _toeplitz_conv_weights(w_oihw, width):
    """Torch conv weight (Cout, Cin, 3, 3) -> (3, width*Cin, width*Cout).

    One block-Toeplitz matrix per ky tap: a matmul of a (rows, width*Cin) slab
    with T[ky] implements the 3-tap correlation along the width axis with
    padding=1 (out-of-range columns simply have no rows -> implicit zero pad).
    """
    cin, cout = w_oihw.shape[1], w_oihw.shape[0]
    wk = jnp.transpose(w_oihw, (2, 3, 1, 0))              # (ky, kx, Cin, Cout)
    wj = jnp.arange(width)[:, None]                       # input column
    wo = jnp.arange(width)[None, :]                       # output column
    kx = wj - wo + 1                                      # tap index, (W, W)
    valid = (kx >= 0) & (kx < 3)
    t = wk[:, jnp.clip(kx, 0, 2)]                         # (3, W, W, Cin, Cout)
    t = jnp.where(valid[None, :, :, None, None], t, 0.0)
    t = jnp.transpose(t, (0, 1, 3, 2, 4))                 # (3, W, Cin, W, Cout)
    return t.reshape(3, width * cin, width * cout)


def _vmem_capacity_bytes():
    # Per-generation VMEM capacity (v5e/v6e 128 MiB, v7x 64 MiB per TC).
    # Conservative v7x-sized fallback if the query is unavailable.
    try:
        return int(pltpu.get_tpu_info().vmem_capacity_bytes)
    except Exception:
        return 64 * 1024 * 1024


def _pick_tile_rows(h, n_batch, w, cin, cmid, cout, budget_bytes, max_rows=256):
    """Largest row tile TH (multiple of 8, divisor of h, TH<=max_rows) that fits
    the VMEM budget; falls back to the full height (block == full dim)."""
    # Fixed cost: Toeplitz weights (bf16), conservatively counted double-buffered.
    fixed = 2 * 2 * 3 * (w * cin * w * cmid + w * cmid * w * cout)
    # Per-row cost: bf16 slab (x2 buffers) + f32 output (x2 buffers) + bf16 mid
    # scratch + f32 epilogue temporaries (rough).
    per_row = (2 * w * cin * 2
               + 2 * w * cout * 4
               + w * cmid * 2
               + w * cmid * 4 * 2
               + w * cout * 4)
    avail = max(budget_bytes - fixed, per_row * 8)
    cap = min(max_rows, max(8, avail // per_row))

    best = None
    for d in range(8, h + 1, 8):
        if h % d == 0 and d <= cap:
            best = d
    if best is None:
        best = h  # block == full dim; the (8,128) rule is satisfied trivially.

    # v7x megacore: keep >= 2 grid steps so both TensorCores get work.
    if n_batch == 1 and best == h:
        for d in range(h // 2, 7, -1):
            if h % d == 0 and d % 8 == 0:
                best = d
                break
    return best


@functools.partial(jax.jit,
                   static_argnames=("tile_rows", "vmem_limit", "single_buffer_weights"))
def _double_conv_impl(x_nchw, params, *, tile_rows, vmem_limit, single_buffer_weights):
    w1, b1, g1, be1, m1, v1, w2, b2, g2, be2, m2, v2 = params
    N, Cin, H, W = x_nchw.shape
    Cmid, Cout = w1.shape[0], w2.shape[0]

    th = tile_rows
    n_tiles = H // th

    # NCHW -> (N, H, W*Cin) bf16: width and channel collapsed into one
    # lane-dense minor dim; bf16 in HBM halves input DMA bytes.
    x = jnp.transpose(x_nchw, (0, 2, 3, 1)).reshape(N, H, W * Cin)
    x = jnp.pad(x, ((0, 0), (2, 2), (0, 0))).astype(jnp.bfloat16)
    # Non-overlapping halo'd slabs -> a plain BlockSpec auto-pipelines (hides
    # the HBM->VMEM copy that was fully synchronous before).
    slabs = jnp.stack([x[:, t * th: t * th + th + 4, :] for t in range(n_tiles)],
                      axis=1)                              # (N, n_tiles, TH+4, W*Cin)

    t1 = _toeplitz_conv_weights(w1, W).astype(jnp.bfloat16)   # (3, W*Cin,  W*Cmid)
    t2 = _toeplitz_conv_weights(w2, W).astype(jnp.bfloat16)   # (3, W*Cmid, W*Cout)

    s1, bb1 = _fold_bn(b1, g1, be1, m1, v1)
    s2, bb2 = _fold_bn(b2, g2, be2, m2, v2)
    s1w, b1w = jnp.tile(s1, W)[None], jnp.tile(bb1, W)[None]  # (1, W*Cmid)
    s2w, b2w = jnp.tile(s2, W)[None], jnp.tile(bb2, W)[None]  # (1, W*Cout)

    kernel = functools.partial(_double_conv_kernel, block_h=th)

    def const_spec(shape):
        idx = lambda n, t, _s=shape: (0,) * len(_s)
        if single_buffer_weights:
            # Invariant operands: single-buffer to reclaim VMEM for TH.
            return pl.BlockSpec(shape, idx, pipeline_mode=pl.Buffered(1))
        return pl.BlockSpec(shape, idx)

    in_specs = [
        pl.BlockSpec((None, None, th + 4, W * Cin), lambda n, t: (n, t, 0, 0)),
        const_spec((3, W * Cin, W * Cmid)),
        const_spec((1, W * Cmid)),
        const_spec((1, W * Cmid)),
        const_spec((3, W * Cmid, W * Cout)),
        const_spec((1, W * Cout)),
        const_spec((1, W * Cout)),
    ]

    out = pl.pallas_call(
        kernel,
        out_shape=jax.ShapeDtypeStruct((N, H, W * Cout), jnp.float32),
        grid_spec=pltpu.PrefetchScalarGridSpec(
            num_scalar_prefetch=0,
            grid=(N, n_tiles),
            in_specs=in_specs,
            out_specs=pl.BlockSpec((None, th, W * Cout), lambda n, t: (n, t, 0)),
            scratch_shapes=[
                pltpu.VMEM((th + 2, W * Cmid), jnp.bfloat16),   # conv1 intermediate
            ],
        ),
        compiler_params=pltpu.CompilerParams(
            dimension_semantics=("parallel", "parallel"),
            vmem_limit_bytes=vmem_limit,
        ),
    )(slabs, t1, s1w, b1w, t2, s2w, b2w)

    out = out.reshape(N, H, W, Cout)
    return jnp.transpose(out, (0, 3, 1, 2))   # back to NCHW


def double_conv(x_nchw, params):
    """x_nchw: (N, Cin, H, W) float32 -> (N, Cout, H, W) float32."""
    N, Cin, H, W = x_nchw.shape
    Cmid, Cout = params[0].shape[0], params[6].shape[0]

    cap = _vmem_capacity_bytes()
    th = _pick_tile_rows(H, N, W, Cin, Cmid, Cout, budget_bytes=int(0.55 * cap))
    vmem_limit = max(32 * 1024 * 1024, min(int(0.75 * cap), 112 * 1024 * 1024))

    try:
        out = _double_conv_impl(x_nchw, params, tile_rows=th,
                                vmem_limit=vmem_limit, single_buffer_weights=True)
        return jax.block_until_ready(out)
    except Exception:
        # pl.Buffered(1) single-buffering not supported by this jax/Mosaic
        # version -> identical kernel with default (double) buffering.
        out = _double_conv_impl(x_nchw, params, tile_rows=th,
                                vmem_limit=vmem_limit, single_buffer_weights=False)
        return jax.block_until_ready(out)


def _reference(x_nchw, params):
    """Pure-JAX f32 reference (lax conv) for correctness checking."""
    w1, b1, g1, be1, m1, v1, w2, b2, g2, be2, m2, v2 = params
    x = jnp.transpose(x_nchw, (0, 2, 3, 1))  # NHWC

    def conv_bn_relu(x, w, b, g, be, m, v):
        w_hwio = jnp.transpose(w, (2, 3, 1, 0))
        y = jax.lax.conv_general_dilated(
            x, w_hwio, window_strides=(1, 1), padding=((1, 1), (1, 1)),
            dimension_numbers=("NHWC", "HWIO", "NHWC"))
        y = y + b
        y = (y - m) / jnp.sqrt(v + 1e-5) * g + be
        return jnp.maximum(y, 0.0)

    y = conv_bn_relu(x, w1, b1, g1, be1, m1, v1)
    y = conv_bn_relu(y, w2, b2, g2, be2, m2, v2)
    return jnp.transpose(y, (0, 3, 1, 2))


def _init_params(key, in_channels, out_channels, mid_channels=None):
    if not mid_channels:
        mid_channels = out_channels
    ks = jax.random.split(key, 8)
    w1 = 0.1 * jax.random.normal(ks[0], (mid_channels, in_channels, 3, 3), jnp.float32)
    b1 = 0.1 * jax.random.normal(ks[1], (mid_channels,), jnp.float32)
    g1 = 1.0 + 0.1 * jax.random.normal(ks[2], (mid_channels,), jnp.float32)
    be1 = 0.1 * jax.random.normal(ks[3], (mid_channels,), jnp.float32)
    m1 = 0.05 * jax.random.normal(ks[4], (mid_channels,), jnp.float32)
    v1 = 1.0 + 0.1 * jnp.abs(jax.random.normal(ks[5], (mid_channels,), jnp.float32))
    w2 = 0.1 * jax.random.normal(ks[6], (out_channels, mid_channels, 3, 3), jnp.float32)
    b2 = 0.1 * jax.random.normal(ks[7], (out_channels,), jnp.float32)
    g2 = jnp.linspace(0.8, 1.2, out_channels, dtype=jnp.float32)
    be2 = jnp.linspace(-0.1, 0.1, out_channels, dtype=jnp.float32)
    m2 = jnp.linspace(-0.05, 0.05, out_channels, dtype=jnp.float32)
    v2 = jnp.linspace(0.9, 1.1, out_channels, dtype=jnp.float32)
    return (w1, b1, g1, be1, m1, v1, w2, b2, g2, be2, m2, v2)


if __name__ == "__main__":
    key = jax.random.PRNGKey(0)
    k_x, k_p = jax.random.split(key)

    N, Cin, H, W = 2, 4, 16, 16
    Cout = 8
    x = jax.random.normal(k_x, (N, Cin, H, W), jnp.float32)
    params = _init_params(k_p, Cin, Cout)

    out = double_conv(x, params)
    out = jax.block_until_ready(out)

    ref = _reference(x, params)
    assert out.shape == (N, Cout, H, W)
    # bf16 MXU operands -> looser tolerance than an f32-only implementation.
    assert jnp.allclose(out, ref, rtol=5e-2, atol=5e-2), "mismatch vs reference"

    print("KERNEL_OK")
</pallas_src>

<mosaic_0001>
module attributes {stable_mosaic.version = 11 : i64} {
  func.func @_double_conv_kernel(%arg0: i32, %arg1: i32, %arg2: memref<1x1x20x64xbf16, #tpu.memory_space<vmem>>, %arg3: memref<3x64x128xbf16, #tpu.memory_space<vmem>>, %arg4: memref<1x128xf32, #tpu.memory_space<vmem>>, %arg5: memref<1x128xf32, #tpu.memory_space<vmem>>, %arg6: memref<3x128x128xbf16, #tpu.memory_space<vmem>>, %arg7: memref<1x128xf32, #tpu.memory_space<vmem>>, %arg8: memref<1x128xf32, #tpu.memory_space<vmem>>, %arg9: memref<1x16x128xf32, #tpu.memory_space<vmem>>, %arg10: memref<18x128xbf16, #tpu.memory_space<vmem>>) attributes {dimension_semantics = [#tpu.dimension_semantics<parallel>, #tpu.dimension_semantics<parallel>], iteration_bounds = array<i64: 2, 1>, scalar_prefetch = 0 : i64, scratch_operands = 1 : i64, tpu.core_type = #tpu.core_type<tc>, window_params = [{transform_indices = @transform_0, window_bounds = array<i64: 1, 1, 20, 64>}, {pipeline_mode = #tpu.pipeline_mode<synchronous>, transform_indices = @transform_1, window_bounds = array<i64: 3, 64, 128>}, {pipeline_mode = #tpu.pipeline_mode<synchronous>, transform_indices = @transform_2, window_bounds = array<i64: 1, 128>}, {pipeline_mode = #tpu.pipeline_mode<synchronous>, transform_indices = @transform_3, window_bounds = array<i64: 1, 128>}, {pipeline_mode = #tpu.pipeline_mode<synchronous>, transform_indices = @transform_4, window_bounds = array<i64: 3, 128, 128>}, {pipeline_mode = #tpu.pipeline_mode<synchronous>, transform_indices = @transform_5, window_bounds = array<i64: 1, 128>}, {pipeline_mode = #tpu.pipeline_mode<synchronous>, transform_indices = @transform_6, window_bounds = array<i64: 1, 128>}, {transform_indices = @transform_7, window_bounds = array<i64: 1, 16, 128>}]} {
    %c0 = arith.constant 0 : index
    %c0_0 = arith.constant 0 : index
    %c0_1 = arith.constant 0 : index
    %c0_2 = arith.constant 0 : index
    %0 = vector.load %arg2[%c0, %c0_0, %c0_1, %c0_2] : memref<1x1x20x64xbf16, #tpu.memory_space<vmem>>, vector<1x1x20x64xbf16>
    %1 = vector.shape_cast %0 : vector<1x1x20x64xbf16> to vector<20x64xbf16>
    %2 = vector.extract_strided_slice %1 {offsets = [0, 0], sizes = [18, 64], strides = [1, 1]} : vector<20x64xbf16> to vector<18x64xbf16>
    %c0_3 = arith.constant 0 : index
    %c0_4 = arith.constant 0 : index
    %c0_5 = arith.constant 0 : index
    %3 = vector.load %arg3[%c0_3, %c0_4, %c0_5] : memref<3x64x128xbf16, #tpu.memory_space<vmem>>, vector<1x64x128xbf16>
    %4 = vector.shape_cast %3 : vector<1x64x128xbf16> to vector<64x128xbf16>
    %cst = arith.constant dense<0.000000e+00> : vector<18x128xf32>
    %5 = tpu.matmul %2, %4, %cst {dimension_numbers = #tpu.dot_dimension_numbers<[1], [0], [0], [1], [0, 0, 1, 1], [], []>} : vector<18x64xbf16>, vector<64x128xbf16>, vector<18x128xf32> -> vector<18x128xf32>
    %6 = vector.extract_strided_slice %1 {offsets = [1, 0], sizes = [18, 64], strides = [1, 1]} : vector<20x64xbf16> to vector<18x64xbf16>
    %c1 = arith.constant 1 : index
    %c0_6 = arith.constant 0 : index
    %c0_7 = arith.constant 0 : index
    %7 = vector.load %arg3[%c1, %c0_6, %c0_7] : memref<3x64x128xbf16, #tpu.memory_space<vmem>>, vector<1x64x128xbf16>
    %8 = vector.shape_cast %7 : vector<1x64x128xbf16> to vector<64x128xbf16>
    %cst_8 = arith.constant dense<0.000000e+00> : vector<18x128xf32>
    %9 = tpu.matmul %6, %8, %cst_8 {dimension_numbers = #tpu.dot_dimension_numbers<[1], [0], [0], [1], [0, 0, 1, 1], [], []>} : vector<18x64xbf16>, vector<64x128xbf16>, vector<18x128xf32> -> vector<18x128xf32>
    %10 = arith.addf %5, %9 : vector<18x128xf32>
    %11 = vector.extract_strided_slice %1 {offsets = [2, 0], sizes = [18, 64], strides = [1, 1]} : vector<20x64xbf16> to vector<18x64xbf16>
    %c2 = arith.constant 2 : index
    %c0_9 = arith.constant 0 : index
    %c0_10 = arith.constant 0 : index
    %12 = vector.load %arg3[%c2, %c0_9, %c0_10] : memref<3x64x128xbf16, #tpu.memory_space<vmem>>, vector<1x64x128xbf16>
    %13 = vector.shape_cast %12 : vector<1x64x128xbf16> to vector<64x128xbf16>
    %cst_11 = arith.constant dense<0.000000e+00> : vector<18x128xf32>
    %14 = tpu.matmul %11, %13, %cst_11 {dimension_numbers = #tpu.dot_dimension_numbers<[1], [0], [0], [1], [0, 0, 1, 1], [], []>} : vector<18x64xbf16>, vector<64x128xbf16>, vector<18x128xf32> -> vector<18x128xf32>
    %15 = arith.addf %10, %14 : vector<18x128xf32>
    %c0_12 = arith.constant 0 : index
    %c0_13 = arith.constant 0 : index
    %16 = vector.load %arg4[%c0_12, %c0_13] : memref<1x128xf32, #tpu.memory_space<vmem>>, vector<1x128xf32>
    %17 = vector.broadcast %16 : vector<1x128xf32> to vector<18x128xf32>
    %18 = arith.mulf %15, %17 : vector<18x128xf32>
    %c0_14 = arith.constant 0 : index
    %c0_15 = arith.constant 0 : index
    %19 = vector.load %arg5[%c0_14, %c0_15] : memref<1x128xf32, #tpu.memory_space<vmem>>, vector<1x128xf32>
    %20 = vector.broadcast %19 : vector<1x128xf32> to vector<18x128xf32>
    %21 = arith.addf %18, %20 : vector<18x128xf32>
    %cst_16 = arith.constant 0.000000e+00 : f32
    %22 = vector.broadcast %cst_16 : f32 to vector<18x128xf32>
    %23 = arith.maximumf %21, %22 : vector<18x128xf32>
    %24 = arith.truncf %23 : vector<18x128xf32> to vector<18x128xbf16>
    %c0_17 = arith.constant 0 : index
    %c0_18 = arith.constant 0 : index
    %25 = vector.load %arg10[%c0_17, %c0_18] : memref<18x128xbf16, #tpu.memory_space<vmem>>, vector<18x128xbf16>
    tpu.vector_store %arg10[%c0_17, %c0_18], %24 {strides = array<i32>} : memref<18x128xbf16, #tpu.memory_space<vmem>>, vector<18x128xbf16>,
    %cst_19 = arith.constant 0.000000e+00 : bf16
    %26 = vector.broadcast %cst_19 : bf16 to vector<1x128xbf16>
    %c0_i32 = arith.constant 0 : i32
    %27 = arith.cmpi eq, %arg1, %c0_i32 : i32
    %28 = arith.extui %27 : i1 to i32
    %c0_i32_20 = arith.constant 0 : i32
    %29 = arith.cmpi ne, %28, %c0_i32_20 : i32
    scf.if %29 {
      %c0_45 = arith.constant 0 : index
      %c0_46 = arith.constant 0 : index
      %59 = vector.load %arg10[%c0_45, %c0_46] : memref<18x128xbf16, #tpu.memory_space<vmem>>, vector<1x128xbf16>
      tpu.vector_store %arg10[%c0_45, %c0_46], %26 {strides = array<i32>} : memref<18x128xbf16, #tpu.memory_space<vmem>>, vector<1x128xbf16>,
    } else {
    }
    %c0_i32_21 = arith.constant 0 : i32
    %30 = arith.cmpi eq, %arg1, %c0_i32_21 : i32
    %31 = arith.extui %30 : i1 to i32
    %c0_i32_22 = arith.constant 0 : i32
    %32 = arith.cmpi ne, %31, %c0_i32_22 : i32
    scf.if %32 {
      %c17 = arith.constant 17 : index
      %c0_45 = arith.constant 0 : index
      %59 = vector.load %arg10[%c17, %c0_45] : memref<18x128xbf16, #tpu.memory_space<vmem>>, vector<1x128xbf16>
      tpu.vector_store %arg10[%c17, %c0_45], %26 {strides = array<i32>} : memref<18x128xbf16, #tpu.memory_space<vmem>>, vector<1x128xbf16>,
    } else {
    }
    %c0_23 = arith.constant 0 : index
    %c0_24 = arith.constant 0 : index
    %33 = vector.load %arg10[%c0_23, %c0_24] : memref<18x128xbf16, #tpu.memory_space<vmem>>, vector<18x128xbf16>
    %34 = vector.extract_strided_slice %33 {offsets = [0, 0], sizes = [16, 128], strides = [1, 1]} : vector<18x128xbf16> to vector<16x128xbf16>
    %c0_25 = arith.constant 0 : index
    %c0_26 = arith.constant 0 : index
    %c0_27 = arith.constant 0 : index
    %35 = vector.load %arg6[%c0_25, %c0_26, %c0_27] : memref<3x128x128xbf16, #tpu.memory_space<vmem>>, vector<1x128x128xbf16>
    %36 = vector.shape_cast %35 : vector<1x128x128xbf16> to vector<128x128xbf16>
    %cst_28 = arith.constant dense<0.000000e+00> : vector<16x128xf32>
    %37 = tpu.matmul %34, %36, %cst_28 {dimension_numbers = #tpu.dot_dimension_numbers<[1], [0], [0], [1], [0, 0, 1, 1], [], []>} : vector<16x128xbf16>, vector<128x128xbf16>, vector<16x128xf32> -> vector<16x128xf32>
    %38 = vector.extract_strided_slice %33 {offsets = [1, 0], sizes = [16, 128], strides = [1, 1]} : vector<18x128xbf16> to vector<16x128xbf16>
    %c1_29 = arith.constant 1 : index
    %c0_30 = arith.constant 0 : index
    %c0_31 = arith.constant 0 : index
    %39 = vector.load %arg6[%c1_29, %c0_30, %c0_31] : memref<3x128x128xbf16, #tpu.memory_space<vmem>>, vector<1x128x128xbf16>
    %40 = vector.shape_cast %39 : vector<1x128x128xbf16> to vector<128x128xbf16>
    %cst_32 = arith.constant dense<0.000000e+00> : vector<16x128xf32>
    %41 = tpu.matmul %38, %40, %cst_32 {dimension_numbers = #tpu.dot_dimension_numbers<[1], [0], [0], [1], [0, 0, 1, 1], [], []>} : vector<16x128xbf16>, vector<128x128xbf16>, vector<16x128xf32> -> vector<16x128xf32>
    %42 = arith.addf %37, %41 : vector<16x128xf32>
    %43 = vector.extract_strided_slice %33 {offsets = [2, 0], sizes = [16, 128], strides = [1, 1]} : vector<18x128xbf16> to vector<16x128xbf16>
    %c2_33 = arith.constant 2 : index
    %c0_34 = arith.constant 0 : index
    %c0_35 = arith.constant 0 : index
    %44 = vector.load %arg6[%c2_33, %c0_34, %c0_35] : memref<3x128x128xbf16, #tpu.memory_space<vmem>>, vector<1x128x128xbf16>
    %45 = vector.shape_cast %44 : vector<1x128x128xbf16> to vector<128x128xbf16>
    %cst_36 = arith.constant dense<0.000000e+00> : vector<16x128xf32>
    %46 = tpu.matmul %43, %45, %cst_36 {dimension_numbers = #tpu.dot_dimension_numbers<[1], [0], [0], [1], [0, 0, 1, 1], [], []>} : vector<16x128xbf16>, vector<128x128xbf16>, vector<16x128xf32> -> vector<16x128xf32>
    %47 = arith.addf %42, %46 : vector<16x128xf32>
    %c0_37 = arith.constant 0 : index
    %c0_38 = arith.constant 0 : index
    %48 = vector.load %arg7[%c0_37, %c0_38] : memref<1x128xf32, #tpu.memory_space<vmem>>, vector<1x128xf32>
    %49 = vector.broadcast %48 : vector<1x128xf32> to vector<16x128xf32>
    %50 = arith.mulf %47, %49 : vector<16x128xf32>
    %c0_39 = arith.constant 0 : index
    %c0_40 = arith.constant 0 : index
    %51 = vector.load %arg8[%c0_39, %c0_40] : memref<1x128xf32, #tpu.memory_space<vmem>>, vector<1x128xf32>
    %52 = vector.broadcast %51 : vector<1x128xf32> to vector<16x128xf32>
    %53 = arith.addf %50, %52 : vector<16x128xf32>
    %cst_41 = arith.constant 0.000000e+00 : f32
    %54 = vector.broadcast %cst_41 : f32 to vector<16x128xf32>
    %55 = arith.maximumf %53, %54 : vector<16x128xf32>
    %c0_42 = arith.constant 0 : index
    %c0_43 = arith.constant 0 : index
    %c0_44 = arith.constant 0 : index
    %56 = vector.load %arg9[%c0_42, %c0_43, %c0_44] : memref<1x16x128xf32, #tpu.memory_space<vmem>>, vector<1x16x128xf32>
    %57 = vector.shape_cast %56 : vector<1x16x128xf32> to vector<16x128xf32>
    %58 = vector.shape_cast %55 : vector<16x128xf32> to vector<1x16x128xf32>
    tpu.vector_store %arg9[%c0_42, %c0_43, %c0_44], %58 {strides = array<i32>} : memref<1x16x128xf32, #tpu.memory_space<vmem>>, vector<1x16x128xf32>,
    return
  }
  func.func @transform_0(%arg0: i32, %arg1: i32) -> (i32, i32, i32, i32) {
    %c0_i32 = arith.constant 0 : i32
    %c0_i32_0 = arith.constant 0 : i32
    %c0_i32_1 = arith.constant 0 : i32
    return %arg0, %arg1, %c0_i32, %c0_i32_0 : i32, i32, i32, i32
  }
  func.func @transform_1(%arg0: i32, %arg1: i32) -> (i32, i32, i32) {
    %c0_i32 = arith.constant 0 : i32
    %c0_i32_0 = arith.constant 0 : i32
    %c0_i32_1 = arith.constant 0 : i32
    %c0_i32_2 = arith.constant 0 : i32
    return %c0_i32, %c0_i32_0, %c0_i32_1 : i32, i32, i32
  }
  func.func @transform_2(%arg0: i32, %arg1: i32) -> (i32, i32) {
    %c0_i32 = arith.constant 0 : i32
    %c0_i32_0 = arith.constant 0 : i32
    %c0_i32_1 = arith.constant 0 : i32
    return %c0_i32, %c0_i32_0 : i32, i32
  }
  func.func @transform_3(%arg0: i32, %arg1: i32) -> (i32, i32) {
    %c0_i32 = arith.constant 0 : i32
    %c0_i32_0 = arith.constant 0 : i32
    %c0_i32_1 = arith.constant 0 : i32
    return %c0_i32, %c0_i32_0 : i32, i32
  }
  func.func @transform_4(%arg0: i32, %arg1: i32) -> (i32, i32, i32) {
    %c0_i32 = arith.constant 0 : i32
    %c0_i32_0 = arith.constant 0 : i32
    %c0_i32_1 = arith.constant 0 : i32
    %c0_i32_2 = arith.constant 0 : i32
    return %c0_i32, %c0_i32_0, %c0_i32_1 : i32, i32, i32
  }
  func.func @transform_5(%arg0: i32, %arg1: i32) -> (i32, i32) {
    %c0_i32 = arith.constant 0 : i32
    %c0_i32_0 = arith.constant 0 : i32
    %c0_i32_1 = arith.constant 0 : i32
    return %c0_i32, %c0_i32_0 : i32, i32
  }
  func.func @transform_6(%arg0: i32, %arg1: i32) -> (i32, i32) {
    %c0_i32 = arith.constant 0 : i32
    %c0_i32_0 = arith.constant 0 : i32
    %c0_i32_1 = arith.constant 0 : i32
    return %c0_i32, %c0_i32_0 : i32, i32
  }
  func.func @transform_7(%arg0: i32, %arg1: i32) -> (i32, i32, i32) {
    %c0_i32 = arith.constant 0 : i32
    %c0_i32_0 = arith.constant 0 : i32
    return %arg0, %arg1, %c0_i32 : i32, i32, i32
  }
}

module attributes {stable_mosaic.version = 11 : i64} {
  func.func @_double_conv_kernel(%arg0: i32, %arg1: i32, %arg2: memref<1x1x20x64xbf16, #tpu.memory_space<vmem>>, %arg3: memref<3x64x128xbf16, #tpu.memory_space<vmem>>, %arg4: memref<1x128xf32, #tpu.memory_space<vmem>>, %arg5: memref<1x128xf32, #tpu.memory_space<vmem>>, %arg6: memref<3x128x128xbf16, #tpu.memory_space<vmem>>, %arg7: memref<1x128xf32, #tpu.memory_space<vmem>>, %arg8: memref<1x128xf32, #tpu.memory_space<vmem>>, %arg9: memref<1x16x128xf32, #tpu.memory_space<vmem>>, %arg10: memref<18x128xbf16, #tpu.memory_space<vmem>>) attributes {dimension_semantics = [#tpu.dimension_semantics<parallel>, #tpu.dimension_semantics<parallel>], iteration_bounds = array<i64: 2, 1>, scalar_prefetch = 0 : i64, scratch_operands = 1 : i64, tpu.core_type = #tpu.core_type<tc>, window_params = [{transform_indices = @transform_0, window_bounds = array<i64: 1, 1, 20, 64>}, {pipeline_mode = #tpu.pipeline_mode<synchronous>, transform_indices = @transform_1, window_bounds = array<i64: 3, 64, 128>}, {pipeline_mode = #tpu.pipeline_mode<synchronous>, transform_indices = @transform_2, window_bounds = array<i64: 1, 128>}, {pipeline_mode = #tpu.pipeline_mode<synchronous>, transform_indices = @transform_3, window_bounds = array<i64: 1, 128>}, {pipeline_mode = #tpu.pipeline_mode<synchronous>, transform_indices = @transform_4, window_bounds = array<i64: 3, 128, 128>}, {pipeline_mode = #tpu.pipeline_mode<synchronous>, transform_indices = @transform_5, window_bounds = array<i64: 1, 128>}, {pipeline_mode = #tpu.pipeline_mode<synchronous>, transform_indices = @transform_6, window_bounds = array<i64: 1, 128>}, {transform_indices = @transform_7, window_bounds = array<i64: 1, 16, 128>}]} {
    %c0 = arith.constant 0 : index
    %c0_0 = arith.constant 0 : index
    %c0_1 = arith.constant 0 : index
    %c0_2 = arith.constant 0 : index
    %0 = vector.load %arg2[%c0, %c0_0, %c0_1, %c0_2] : memref<1x1x20x64xbf16, #tpu.memory_space<vmem>>, vector<1x1x20x64xbf16>
    %1 = vector.shape_cast %0 : vector<1x1x20x64xbf16> to vector<20x64xbf16>
    %2 = vector.extract_strided_slice %1 {offsets = [0, 0], sizes = [18, 64], strides = [1, 1]} : vector<20x64xbf16> to vector<18x64xbf16>
    %c0_3 = arith.constant 0 : index
    %c0_4 = arith.constant 0 : index
    %c0_5 = arith.constant 0 : index
    %3 = vector.load %arg3[%c0_3, %c0_4, %c0_5] : memref<3x64x128xbf16, #tpu.memory_space<vmem>>, vector<1x64x128xbf16>
    %4 = vector.shape_cast %3 : vector<1x64x128xbf16> to vector<64x128xbf16>
    %cst = arith.constant dense<0.000000e+00> : vector<18x128xf32>
    %5 = tpu.matmul %2, %4, %cst {dimension_numbers = #tpu.dot_dimension_numbers<[1], [0], [0], [1], [0, 0, 1, 1], [], []>} : vector<18x64xbf16>, vector<64x128xbf16>, vector<18x128xf32> -> vector<18x128xf32>
    %6 = vector.extract_strided_slice %1 {offsets = [1, 0], sizes = [18, 64], strides = [1, 1]} : vector<20x64xbf16> to vector<18x64xbf16>
    %c1 = arith.constant 1 : index
    %c0_6 = arith.constant 0 : index
    %c0_7 = arith.constant 0 : index
    %7 = vector.load %arg3[%c1, %c0_6, %c0_7] : memref<3x64x128xbf16, #tpu.memory_space<vmem>>, vector<1x64x128xbf16>
    %8 = vector.shape_cast %7 : vector<1x64x128xbf16> to vector<64x128xbf16>
    %cst_8 = arith.constant dense<0.000000e+00> : vector<18x128xf32>
    %9 = tpu.matmul %6, %8, %cst_8 {dimension_numbers = #tpu.dot_dimension_numbers<[1], [0], [0], [1], [0, 0, 1, 1], [], []>} : vector<18x64xbf16>, vector<64x128xbf16>, vector<18x128xf32> -> vector<18x128xf32>
    %10 = arith.addf %5, %9 : vector<18x128xf32>
    %11 = vector.extract_strided_slice %1 {offsets = [2, 0], sizes = [18, 64], strides = [1, 1]} : vector<20x64xbf16> to vector<18x64xbf16>
    %c2 = arith.constant 2 : index
    %c0_9 = arith.constant 0 : index
    %c0_10 = arith.constant 0 : index
    %12 = vector.load %arg3[%c2, %c0_9, %c0_10] : memref<3x64x128xbf16, #tpu.memory_space<vmem>>, vector<1x64x128xbf16>
    %13 = vector.shape_cast %12 : vector<1x64x128xbf16> to vector<64x128xbf16>
    %cst_11 = arith.constant dense<0.000000e+00> : vector<18x128xf32>
    %14 = tpu.matmul %11, %13, %cst_11 {dimension_numbers = #tpu.dot_dimension_numbers<[1], [0], [0], [1], [0, 0, 1, 1], [], []>} : vector<18x64xbf16>, vector<64x128xbf16>, vector<18x128xf32> -> vector<18x128xf32>
    %15 = arith.addf %10, %14 : vector<18x128xf32>
    %c0_12 = arith.constant 0 : index
    %c0_13 = arith.constant 0 : index
    %16 = vector.load %arg4[%c0_12, %c0_13] : memref<1x128xf32, #tpu.memory_space<vmem>>, vector<1x128xf32>
    %17 = vector.broadcast %16 : vector<1x128xf32> to vector<18x128xf32>
    %18 = arith.mulf %15, %17 : vector<18x128xf32>
    %c0_14 = arith.constant 0 : index
    %c0_15 = arith.constant 0 : index
    %19 = vector.load %arg5[%c0_14, %c0_15] : memref<1x128xf32, #tpu.memory_space<vmem>>, vector<1x128xf32>
    %20 = vector.broadcast %19 : vector<1x128xf32> to vector<18x128xf32>
    %21 = arith.addf %18, %20 : vector<18x128xf32>
    %cst_16 = arith.constant 0.000000e+00 : f32
    %22 = vector.broadcast %cst_16 : f32 to vector<18x128xf32>
    %23 = arith.maximumf %21, %22 : vector<18x128xf32>
    %24 = arith.truncf %23 : vector<18x128xf32> to vector<18x128xbf16>
    %c0_17 = arith.constant 0 : index
    %c0_18 = arith.constant 0 : index
    %25 = vector.load %arg10[%c0_17, %c0_18] : memref<18x128xbf16, #tpu.memory_space<vmem>>, vector<18x128xbf16>
    tpu.vector_store %arg10[%c0_17, %c0_18], %24 {strides = array<i32>} : memref<18x128xbf16, #tpu.memory_space<vmem>>, vector<18x128xbf16>,
    %cst_19 = arith.constant 0.000000e+00 : bf16
    %26 = vector.broadcast %cst_19 : bf16 to vector<1x128xbf16>
    %c0_i32 = arith.constant 0 : i32
    %27 = arith.cmpi eq, %arg1, %c0_i32 : i32
    %28 = arith.extui %27 : i1 to i32
    %c0_i32_20 = arith.constant 0 : i32
    %29 = arith.cmpi ne, %28, %c0_i32_20 : i32
    scf.if %29 {
      %c0_45 = arith.constant 0 : index
      %c0_46 = arith.constant 0 : index
      %59 = vector.load %arg10[%c0_45, %c0_46] : memref<18x128xbf16, #tpu.memory_space<vmem>>, vector<1x128xbf16>
      tpu.vector_store %arg10[%c0_45, %c0_46], %26 {strides = array<i32>} : memref<18x128xbf16, #tpu.memory_space<vmem>>, vector<1x128xbf16>,
    } else {
    }
    %c0_i32_21 = arith.constant 0 : i32
    %30 = arith.cmpi eq, %arg1, %c0_i32_21 : i32
    %31 = arith.extui %30 : i1 to i32
    %c0_i32_22 = arith.constant 0 : i32
    %32 = arith.cmpi ne, %31, %c0_i32_22 : i32
    scf.if %32 {
      %c17 = arith.constant 17 : index
      %c0_45 = arith.constant 0 : index
      %59 = vector.load %arg10[%c17, %c0_45] : memref<18x128xbf16, #tpu.memory_space<vmem>>, vector<1x128xbf16>
      tpu.vector_store %arg10[%c17, %c0_45], %26 {strides = array<i32>} : memref<18x128xbf16, #tpu.memory_space<vmem>>, vector<1x128xbf16>,
    } else {
    }
    %c0_23 = arith.constant 0 : index
    %c0_24 = arith.constant 0 : index
    %33 = vector.load %arg10[%c0_23, %c0_24] : memref<18x128xbf16, #tpu.memory_space<vmem>>, vector<18x128xbf16>
    %34 = vector.extract_strided_slice %33 {offsets = [0, 0], sizes = [16, 128], strides = [1, 1]} : vector<18x128xbf16> to vector<16x128xbf16>
    %c0_25 = arith.constant 0 : index
    %c0_26 = arith.constant 0 : index
    %c0_27 = arith.constant 0 : index
    %35 = vector.load %arg6[%c0_25, %c0_26, %c0_27] : memref<3x128x128xbf16, #tpu.memory_space<vmem>>, vector<1x128x128xbf16>
    %36 = vector.shape_cast %35 : vector<1x128x128xbf16> to vector<128x128xbf16>
    %cst_28 = arith.constant dense<0.000000e+00> : vector<16x128xf32>
    %37 = tpu.matmul %34, %36, %cst_28 {dimension_numbers = #tpu.dot_dimension_numbers<[1], [0], [0], [1], [0, 0, 1, 1], [], []>} : vector<16x128xbf16>, vector<128x128xbf16>, vector<16x128xf32> -> vector<16x128xf32>
    %38 = vector.extract_strided_slice %33 {offsets = [1, 0], sizes = [16, 128], strides = [1, 1]} : vector<18x128xbf16> to vector<16x128xbf16>
    %c1_29 = arith.constant 1 : index
    %c0_30 = arith.constant 0 : index
    %c0_31 = arith.constant 0 : index
    %39 = vector.load %arg6[%c1_29, %c0_30, %c0_31] : memref<3x128x128xbf16, #tpu.memory_space<vmem>>, vector<1x128x128xbf16>
    %40 = vector.shape_cast %39 : vector<1x128x128xbf16> to vector<128x128xbf16>
    %cst_32 = arith.constant dense<0.000000e+00> : vector<16x128xf32>
    %41 = tpu.matmul %38, %40, %cst_32 {dimension_numbers = #tpu.dot_dimension_numbers<[1], [0], [0], [1], [0, 0, 1, 1], [], []>} : vector<16x128xbf16>, vector<128x128xbf16>, vector<16x128xf32> -> vector<16x128xf32>
    %42 = arith.addf %37, %41 : vector<16x128xf32>
    %43 = vector.extract_strided_slice %33 {offsets = [2, 0], sizes = [16, 128], strides = [1, 1]} : vector<18x128xbf16> to vector<16x128xbf16>
    %c2_33 = arith.constant 2 : index
    %c0_34 = arith.constant 0 : index
    %c0_35 = arith.constant 0 : index
    %44 = vector.load %arg6[%c2_33, %c0_34, %c0_35] : memref<3x128x128xbf16, #tpu.memory_space<vmem>>, vector<1x128x128xbf16>
    %45 = vector.shape_cast %44 : vector<1x128x128xbf16> to vector<128x128xbf16>
    %cst_36 = arith.constant dense<0.000000e+00> : vector<16x128xf32>
    %46 = tpu.matmul %43, %45, %cst_36 {dimension_numbers = #tpu.dot_dimension_numbers<[1], [0], [0], [1], [0, 0, 1, 1], [], []>} : vector<16x128xbf16>, vector<128x128xbf16>, vector<16x128xf32> -> vector<16x128xf32>
    %47 = arith.addf %42, %46 : vector<16x128xf32>
    %c0_37 = arith.constant 0 : index
    %c0_38 = arith.constant 0 : index
    %48 = vector.load %arg7[%c0_37, %c0_38] : memref<1x128xf32, #tpu.memory_space<vmem>>, vector<1x128xf32>
    %49 = vector.broadcast %48 : vector<1x128xf32> to vector<16x128xf32>
    %50 = arith.mulf %47, %49 : vector<16x128xf32>
    %c0_39 = arith.constant 0 : index
    %c0_40 = arith.constant 0 : index
    %51 = vector.load %arg8[%c0_39, %c0_40] : memref<1x128xf32, #tpu.memory_space<vmem>>, vector<1x128xf32>
    %52 = vector.broadcast %51 : vector<1x128xf32> to vector<16x128xf32>
    %53 = arith.addf %50, %52 : vector<16x128xf32>
    %cst_41 = arith.constant 0.000000e+00 : f32
    %54 = vector.broadcast %cst_41 : f32 to vector<16x128xf32>
    %55 = arith.maximumf %53, %54 : vector<16x128xf32>
    %c0_42 = arith.constant 0 : index
    %c0_43 = arith.constant 0 : index
    %c0_44 = arith.constant 0 : index
    %56 = vector.load %arg9[%c0_42, %c0_43, %c0_44] : memref<1x16x128xf32, #tpu.memory_space<vmem>>, vector<1x16x128xf32>
    %57 = vector.shape_cast %56 : vector<1x16x128xf32> to vector<16x128xf32>
    %58 = vector.shape_cast %55 : vector<16x128xf32> to vector<1x16x128xf32>
    tpu.vector_store %arg9[%c0_42, %c0_43, %c0_44], %58 {strides = array<i32>} : memref<1x16x128xf32, #tpu.memory_space<vmem>>, vector<1x16x128xf32>,
    return
  }
  func.func @transform_0(%arg0: i32, %arg1: i32) -> (i32, i32, i32, i32) {
    %c0_i32 = arith.constant 0 : i32
    %c0_i32_0 = arith.constant 0 : i32
    %c0_i32_1 = arith.constant 0 : i32
    return %arg0, %arg1, %c0_i32, %c0_i32_0 : i32, i32, i32, i32
  }
  func.func @transform_1(%arg0: i32, %arg1: i32) -> (i32, i32, i32) {
    %c0_i32 = arith.constant 0 : i32
    %c0_i32_0 = arith.constant 0 : i32
    %c0_i32_1 = arith.constant 0 : i32
    %c0_i32_2 = arith.constant 0 : i32
    return %c0_i32, %c0_i32_0, %c0_i32_1 : i32, i32, i32
  }
  func.func @transform_2(%arg0: i32, %arg1: i32) -> (i32, i32) {
    %c0_i32 = arith.constant 0 : i32
    %c0_i32_0 = arith.constant 0 : i32
    %c0_i32_1 = arith.constant 0 : i32
    return %c0_i32, %c0_i32_0 : i32, i32
  }
  func.func @transform_3(%arg0: i32, %arg1: i32) -> (i32, i32) {
    %c0_i32 = arith.constant 0 : i32
    %c0_i32_0 = arith.constant 0 : i32
    %c0_i32_1 = arith.constant 0 : i32
    return %c0_i32, %c0_i32_0 : i32, i32
  }
  func.func @transform_4(%arg0: i32, %arg1: i32) -> (i32, i32, i32) {
    %c0_i32 = arith.constant 0 : i32
    %c0_i32_0 = arith.constant 0 : i32
    %c0_i32_1 = arith.constant 0 : i32
    %c0_i32_2 = arith.constant 0 : i32
    return %c0_i32, %c0_i32_0, %c0_i32_1 : i32, i32, i32
  }
  func.func @transform_5(%arg0: i32, %arg1: i32) -> (i32, i32) {
    %c0_i32 = arith.constant 0 : i32
    %c0_i32_0 = arith.constant 0 : i32
    %c0_i32_1 = arith.constant 0 : i32
    return %c0_i32, %c0_i32_0 : i32, i32
  }
  func.func @transform_6(%arg0: i32, %arg1: i32) -> (i32, i32) {
    %c0_i32 = arith.constant 0 : i32
    %c0_i32_0 = arith.constant 0 : i32
    %c0_i32_1 = arith.constant 0 : i32
    return %c0_i32, %c0_i32_0 : i32, i32
  }
  func.func @transform_7(%arg0: i32, %arg1: i32) -> (i32, i32, i32) {
    %c0_i32 = arith.constant 0 : i32
    %c0_i32_0 = arith.constant 0 : i32
    return %arg0, %arg1, %c0_i32 : i32, i32, i32
  }
}

</mosaic_0001>

<bundles_post_ra>
// kernel: tile.23
= control target key start
LH: loop header
LB: loop body
LE: loop exit
PB: predicated region body
PF: predicated region fallthrough
CT: control target
= control target key end

     0   :  { %s28_s0 = inlined_call_operand.vmem [shape: f32[8], index: 0, kind: input, shape index: {}]   ;;  %s29_s1 = inlined_call_operand.vmem [shape: f32[16,8], index: 1, kind: output, shape index: {}]  }
   0x1   :  { %v4_v0 = vld [vmem:[%s28_s0] ss:$0 sm:$0xff] }
   0x2   :  { %5 = vst [vmem:[%s29_s1] sm:$0xff] %v4_v0 }
   0x3   :  { %8 = vst [vmem:[%s29_s1 + $0x8] sm:$0xff] %v4_v0 }

// kernel: tile.24
= control target key start
LH: loop header
LB: loop body
LE: loop exit
PB: predicated region body
PF: predicated region fallthrough
CT: control target
= control target key end

     0   :  { %s131_s10 = smov 120   ;;  %s132_s11 = smov 104   ;;  %vm3_vm0 = vcmask 64512   ;;  %vm9_vm1 = vcmask 1048512   ;;  %vm15_vm2 = vcmask 982912   ;;  %vm21_vm3 = vcmask 917312   ;;  %s207_s0 = inlined_call_operand.vmem [shape: f32[16,8], index: 0, kind: input, shape index: {}]   ;;  %s208_s1 = inlined_call_operand.vmem [shape: f32[1,128], index: 1, kind: output, shape index: {}]  }
   0x1   :  { %v101_v0 = vld [vmem:[%s207_s0 + $0xf] sm:$0x1]   ;;  %v103_v1 = vld [vmem:[%s207_s0 + $0xd] sm:$0x1]   ;;  %v105_v2 = vld [vmem:[%s207_s0 + $0xb] sm:$0x1]  }
   0x2   :  { %7 = vrot.lane.b32.xlu0 %v101_v0, %s131_s10  ;;  %19 = vrot.lane.b32.xlu1 %v103_v1, %s132_s11  ;;  %s133_s14 = smov 88   ;;  %v102_v3 = vld [vmem:[%s207_s0 + $0xe] sm:$0x1]   ;;  %v104_v4 = vld [vmem:[%s207_s0 + $0xc] sm:$0x1]   ;;  %s134_s19 = smov 112  }
   0x3   :  { %31 = vrot.lane.b32.xlu2 %v105_v2, %s133_s14  ;;  %s135_s20 = smov 96   ;;  %v106_v5 = vld [vmem:[%s207_s0 + $0xa] sm:$0x1]   ;;  %s136_s23 = smov 80   ;;  %v107_v6 = vld [vmem:[%s207_s0 + $0x9] sm:$0x1]  }
   0x4   :  { %v108_v7 = vld [vmem:[%s207_s0 + $0x8] sm:$0x1]   ;;  %s137_s28 = smov 72   ;;  %s138_s29 = smov 64   ;;  %v109_v8 = vld [vmem:[%s207_s0 + $0x7] sm:$0x1]  }
   0x5   :  { %s139_s3 = smov 56   ;;  %v110_v9 = vld [vmem:[%s207_s0 + $0x6] sm:$0x1]   ;;  %v111_v10 = vld [vmem:[%s207_s0 + $0x5] sm:$0x1]   ;;  %s140_s8 = smov 48  }
   0x6   :  { %s141_s9 = smov 40   ;;  %v112_v11 = vld [vmem:[%s207_s0 + $0x4] sm:$0x1]   ;;  %s142_s12 = smov 32   ;;  %v113_v12 = vld [vmem:[%s207_s0 + $0x3] sm:$0x1]  }
   0x7   :  { %v114_v13 = vld [vmem:[%s207_s0 + $0x2] sm:$0x1]   ;;  %s143_s17 = smov 24   ;;  %s144_s18 = smov 16   ;;  %v115_v14 = vld [vmem:[%s207_s0 + $0x1] sm:$0x1]  }
   0x8   :  { %s145_s21 = smov 8   ;;  %v2_v15 = vld [vmem:[%s207_s0] sm:$0x1]   ;;  %vm27_vm4 = vcmask 851712   ;;  %vm33_vm5 = vcmask 786112   ;;  %vm39_vm6 = vcmask 720512  }
   0x9   :  { %4 = vst.msk [vmem:[#allocation0] sm:$0x1] %vm3_vm0, %v2_v15   ;;  %vm45_vm7 = vcmask 654912   ;;  %vm51_vm8 = vcmask 589312   ;;  %vm57_vm9 = vcmask 523712   ;;  %vm63_vm10 = vcmask 458112  }
   0xa   :  { %13 = vrot.lane.b32.xlu0 %v102_v3, %s134_s19  ;;  %25 = vrot.lane.b32.xlu1 %v104_v4, %s135_s20  ;;  %vm69_vm11 = vcmask 392512   ;;  %vm75_vm12 = vcmask 326912   ;;  %vm81_vm13 = vcmask 261312   ;;  %vm87_vm14 = vcmask 195712  }
   0xb   :  { %37 = vrot.lane.b32.xlu2 %v106_v5, %s136_s23  ;;  %vm93_vm15 = vcmask 130112  }
  0x12   :  { %43 = vrot.lane.b32.xlu0 %v107_v6, %s137_s28  ;;  %49 = vrot.lane.b32.xlu1 %v108_v7, %s138_s29 }
  0x13   :  { %55 = vrot.lane.b32.xlu2 %v109_v8, %s139_s3 }
  0x1a   :  { %61 = vrot.lane.b32.xlu0 %v110_v9, %s140_s8  ;;  %67 = vrot.lane.b32.xlu1 %v111_v10, %s141_s9 }
  0x1b   :  { %73 = vrot.lane.b32.xlu2 %v112_v11, %s142_s12 }
  0x22   :  { %79 = vrot.lane.b32.xlu0 %v113_v12, %s143_s17  ;;  %85 = vrot.lane.b32.xlu1 %v114_v13, %s144_s18 }
  0x23   :  { %91 = vrot.lane.b32.xlu2 %v115_v14, %s145_s21 }
  0x5d   :  { %v32_v16 = vpop.permute.xlu2 %31  }
  0x65   :  { %v38_v17 = vpop.permute.xlu2 %37  }
  0x6d   :  { %v56_v18 = vpop.permute.xlu2 %55  }
  0x74   :  { %v8_v19 = vpop.permute.xlu0 %7   ;;  %v20_v20 = vpop.permute.xlu1 %19  }
  0x75   :  { %10 = vst.msk [vmem:[#allocation0] sm:$0x1] %vm9_vm1, %v8_v19   ;;  %v74_v21 = vpop.permute.xlu2 %73  }
  0x7c   :  { %v14_v22 = vpop.permute.xlu0 %13   ;;  %v26_v23 = vpop.permute.xlu1 %25  }
  0x7d   :  { %16 = vst.msk [vmem:[#allocation0] sm:$0x1] %vm15_vm2, %v14_v22   ;;  %v92_v24 = vpop.permute.xlu2 %91  }
  0x7e   :  { %22 = vst.msk [vmem:[#allocation0] sm:$0x1] %vm21_vm3, %v20_v20  }
  0x7f   :  { %28 = vst.msk [vmem:[#allocation0] sm:$0x1] %vm27_vm4, %v26_v23  }
  0x80   :  { %34 = vst.msk [vmem:[#allocation0] sm:$0x1] %vm33_vm5, %v32_v16  }
  0x81   :  { %40 = vst.msk [vmem:[#allocation0] sm:$0x1] %vm39_vm6, %v38_v17  }
  0x84   :  { %v44_v25 = vpop.permute.xlu0 %43   ;;  %v50_v26 = vpop.permute.xlu1 %49  }
  0x85   :  { %46 = vst.msk [vmem:[#allocation0] sm:$0x1] %vm45_vm7, %v44_v25  }
  0x86   :  { %52 = vst.msk [vmem:[#allocation0] sm:$0x1] %vm51_vm8, %v50_v26  }
  0x87   :  { %58 = vst.msk [vmem:[#allocation0] sm:$0x1] %vm57_vm9, %v56_v18  }
  0x8c   :  { %v62_v27 = vpop.permute.xlu0 %61   ;;  %v68_v28 = vpop.permute.xlu1 %67  }
  0x8d   :  { %64 = vst.msk [vmem:[#allocation0] sm:$0x1] %vm63_vm10, %v62_v27  }
  0x8e   :  { %70 = vst.msk [vmem:[#allocation0] sm:$0x1] %vm69_vm11, %v68_v28  }
  0x8f   :  { %76 = vst.msk [vmem:[#allocation0] sm:$0x1] %vm75_vm12, %v74_v21  }
  0x94   :  { %v80_v29 = vpop.permute.xlu0 %79   ;;  %v86_v30 = vpop.permute.xlu1 %85  }
  0x95   :  { %82 = vst.msk [vmem:[#allocation0] sm:$0x1] %vm81_vm13, %v80_v29  }
  0x96   :  { %88 = vst.msk [vmem:[#allocation0] sm:$0x1] %vm87_vm14, %v86_v30  }
  0x97   :  { %94 = vst.msk [vmem:[#allocation0] sm:$0x1] %vm93_vm15, %v92_v24  }
  0x9e   :  { %v97_v31 = vld [vmem:[#allocation0] sm:$0x1] }
  0x9f   :  { %100 = vst [vmem:[%s208_s1] sm:$0x1] %v97_v31 }

// kernel: _double_conv_impl.1
= control target key start
LH: loop header
LB: loop body
LE: loop exit
PB: predicated region body
PF: predicated region fallthrough
CT: control target
= control target key end

     0   :  { %s1284_s24 = smov 0   ;;  %s1286_s25 = smov 0   ;;  %s1445_s0 = inlined_call_operand.vmem [shape: bf16[2,1,20,64], index: 0, kind: input, shape index: {}]   ;;  %s1446_s1 = inlined_call_operand.vmem [shape: bf16[3,64,128], index: 1, kind: input, shape index: {}]   ;;  %s1447_s2 = inlined_call_operand.vmem [shape: f32[1,128], index: 2, kind: input, shape index: {}]   ;;  %s1448_s3 = inlined_call_operand.vmem [shape: f32[1,128], index: 3, kind: input, shape index: {}]   ;;  %s1449_s4 = inlined_call_operand.vmem [shape: bf16[3,128,128], index: 4, kind: input, shape index: {}]   ;;  %s1450_s5 = inlined_call_operand.vmem [shape: f32[1,128], index: 5, kind: input, shape index: {}]   ;;  %s1451_s6 = inlined_call_operand.vmem [shape: f32[1,128], index: 6, kind: input, shape index: {}]   ;;  %s1452_s7 = inlined_call_operand.vmem [shape: f32[2,16,128], index: 7, kind: output, shape index: {}]  }
   0x1   :  { %s1288_s26 = smov 0  }
   0x2 LB: > { %s29_s27 = sadd.s32 1, %s1238_s25  ;;  %p935_p0 = scmp.ge.s32.totalorder %s1242_s26, 1  ;;  %s1242_s26 = sphi %s1288_s26, %s17_s26   ;;  %s1238_s25 = sphi %s1286_s25, %s1454_s25   ;;  %s1234_s24 = sphi %s1284_s24, %s1453_s24  }
   0x3   : > { %p31_p1 = scmp.ge.s32.totalorder %s29_s27, 2  ;;  %p257_p2 = scmp.lt.s32.totalorder %s1242_s26, 3 }
   0x5   : > { %s1456_s27 = smov (%p31_p1, %s29_s27), 0  ;;  %p258_p3 = pnand %p935_p0, %p257_p2 }
   0x6   : > { %p297_p4 = scmp.lt.s32.totalorder (!%p258_p3), %s1234_s24, 1 }
   0x7   : > { %261 = sbr.rel (%p258_p3) target bundleno = 365 (0x16d), region = 48 }
   0xc   : > { %v1156_v0 = vld [vmem:[%s1446_s1 + $0x38] sm:$0xff]  ;;  %v1155_v3 = vld [vmem:[%s1446_s1 + $0x30] sm:$0xff]  ;;  %s1458_s24 = smov (!%p297_p4, %s1234_s24), 1  ;;  %v1154_v6 = vld [vmem:[%s1446_s1 + $0x28] sm:$0xff]  ;;  %vm465_vm0 = vcmask 1046528   ;;  %vm385_vm2 = vcmask 523264  }
   0xd   : > { %v1152_v1 = vld [vmem:[%s1446_s1 + $0x18] sm:$0xff]  ;;  %396 = vmatpush.bf16.msra.mxu0 %v1156_v0  ;;  %v1151_v4 = vld [vmem:[%s1446_s1 + $0x10] sm:$0xff]  ;;  %s1191_s17 = smul.u32 12, %s1458_s24  ;;  %v1150_v7 = vld [vmem:[%s1446_s1 + $0x8] sm:$0xff]  ;;  %vm345_vm1 = vsmask.f32 7424 }
   0xe   : > { %v1160_v2 = vld [vmem:[%s1446_s1 + $0x58] sm:$0xff]  ;;  %442 = vmatpush.bf16.msra.mxu1 %v1152_v1  ;;  %v1159_v5 = vld [vmem:[%s1446_s1 + $0x50] sm:$0xff]  ;;  %v1158_v8 = vld [vmem:[%s1446_s1 + $0x48] sm:$0xff]  ;;  %vm547_vm3 = vcmask 1040384   ;;  %vm548_vm4 = vsmask.f32 256 }
   0xf   : > { %503 = vmatpush.bf16.msra.mxu2 %v1160_v2  ;;  %s305_s28 = scalar_lea.vmem %s1445_s0, %s1191_s17  ;;  %v1153_v14 = vld [vmem:[%s1446_s1 + $0x20] sm:$0xff]  ;;  %v1169_v28 = vld [vmem:[%s1449_s4 + $0x38] sm:$0xff]  ;;  %v1168_v29 = vld [vmem:[%s1449_s4 + $0x30] sm:$0xff]  ;;  %vm553_vm6 = vsmask.f32 7938  ;;  %s1147_s13 = sshll.u32 %s1458_s24, 4 }
  0x10   : > { %v1148_v9 = vld [vmem:[%s305_s28] sm:$0xff]  ;;  %v319_v10 = vld [vmem:[%s305_s28 + $0x8] sm:$0x3]  ;;  %v1185_v32 = vld [vmem:[%s1449_s4 + $0xb8] sm:$0xff]  ;;  %s314_s16 = scalar_lea.vmem %s1452_s7, %s1147_s13 }
  0x11   : > { %397 = vmatpush.bf16.msra.mxu0 %v1155_v3  ;;  %v342_v11 = vunpack.c.l.b16 %v319_v10  ;;  %v347_v12 = vshrl.u32 %v1148_v9, 16  ;;  %v349_v13 = vshll.u32 %v1148_v9, 16  ;;  %v1149_v15 = vld [vmem:[%s1446_s1] sm:$0xff]  ;;  %v466_v19 = vrot.slane %v1148_v9, 1  ;;  %v1167_v30 = vld [vmem:[%s1449_s4 + $0x28] sm:$0xff]  ;;  %v1177_v33 = vld [vmem:[%s1449_s4 + $0x78] sm:$0xff] }
  0x12   : > { %443 = vmatpush.bf16.msra.mxu1 %v1151_v4  ;;  %v1157_v17 = vld [vmem:[%s1446_s1 + $0x40] sm:$0xff]  ;;  %v1165_v34 = vld [vmem:[%s1449_s4 + $0x18] sm:$0xff]  ;;  %663 = vmatpush.bf16.msra.mxu3 %v1177_v33  ;;  %v1184_v35 = vld [vmem:[%s1449_s4 + $0xb0] sm:$0xff] }
  0x13   : > { %504 = vmatpush.bf16.msra.mxu2 %v1159_v5  ;;  %v344_v16 = vpack.c.b16 %v342_v11, %v342_v11  ;;  %v351_v18 = vrot.slane %v349_v13, 1  ;;  %v1166_v31 = vld [vmem:[%s1449_s4 + $0x20] sm:$0xff]  ;;  %v1176_v36 = vld [vmem:[%s1449_s4 + $0x70] sm:$0xff]  ;;  %v1183_v40 = vld [vmem:[%s1449_s4 + $0xa8] sm:$0xff] }
  0x14   : > { %v1164_v37 = vld [vmem:[%s1449_s4 + $0x10] sm:$0xff]  ;;  %v1175_v41 = vld [vmem:[%s1449_s4 + $0x68] sm:$0xff]  ;;  %v1182_v43 = vld [vmem:[%s1449_s4 + $0xa0] sm:$0xff] }
  0x15   : > { %398 = vmatpush.bf16.msra.mxu0 %v1154_v6  ;;  %v354_v20 = vshll.u32 %v344_v16, 16  ;;  %v467_v21 = vrot.slane %v344_v16, 1  ;;  %v352_v22 = vor.u32 %v351_v18, %v347_v12  ;;  %v358_v26 = vshrl.u32 %v344_v16, 16  ;;  %v1163_v42 = vld [vmem:[%s1449_s4 + $0x8] sm:$0xff]  ;;  %v1174_v46 = vld [vmem:[%s1449_s4 + $0x60] sm:$0xff]  ;;  %v1181_v50 = vld [vmem:[%s1449_s4 + $0x98] sm:$0xff] }
  0x16   : > { %444 = vmatpush.bf16.msra.mxu1 %v1150_v7  ;;  %664 = vmatpush.bf16.msra.mxu3 %v1176_v36  ;;  %v1162_v47 = vld [vmem:[%s1449_s4] sm:$0xff]  ;;  %v1173_v53 = vld [vmem:[%s1449_s4 + $0x58] sm:$0xff]  ;;  %v1180_v54 = vld [vmem:[%s1449_s4 + $0x90] sm:$0xff] }
  0x17   : > { %505 = vmatpush.bf16.msra.mxu2 %v1158_v8  ;;  %v356_v23 = vrot.slane %v354_v20, 1  ;;  %v468_v24 = vsel %vm465_vm0, %v466_v19, %v467_v21  ;;  %v1216_v52 = vld [vmem:[%s1447_s2] ss:$0 sm:$0xff]  ;;  %v1172_v55 = vld [vmem:[%s1449_s4 + $0x50] sm:$0xff]  ;;  %v1179_v60 = vld [vmem:[%s1449_s4 + $0x88] sm:$0xff] }
  0x18   : > { %v1217_v57 = vld [vmem:[%s1448_s3] ss:$0 sm:$0xff]  ;;  %v1171_v0 = vld [vmem:[%s1449_s4 + $0x48] sm:$0xff]  ;;  %vm549_vm5 = vmand %vm547_vm3, %vm548_vm4 }
  0x19   : > { %399 = vmatpush.bf16.msra.mxu0 %v1153_v14  ;;  %v357_v25 = vsel %vm345_vm1, %v352_v22, %v356_v23  ;;  %v360_v27 = vor.u32 %v358_v26, %v356_v23  ;;  %v1178_v3 = vld [vmem:[%s1449_s4 + $0x80] sm:$0xff]  ;;  %vm554_vm7 = vmand %vm547_vm3, %vm553_vm6 }
  0x1a   : > { %445 = vmatpush.bf16.msra.mxu1 %v1149_v15  ;;  %665 = vmatpush.bf16.msra.mxu3 %v1175_v41  ;;  %v1170_v6 = vld [vmem:[%s1449_s4 + $0x40] sm:$0xff] }
  0x1b   : > { %506 = vmatpush.bf16.msra.mxu2 %v1157_v17  ;;  %v1218_v41 = vld [vmem:[%s1450_s5] ss:$0 sm:$0xff] }
  0x1c   : > { %967 = vmatmul.msk.bf16.vlgmr.msra.gmra.mxu0 %vm385_vm2, %v357_v25 }
  0x1d   : > { %985 = vmatmul.msk.bf16.vlgmr.msra.gmra.mxu1 %vm385_vm2, %v1148_v9  ;;  %726 = vmatpush.bf16.msrb.mxu0 %v1169_v28 }
  0x1e   : > { %1011 = vmatmul.msk.bf16.vlgmr.msra.gmra.mxu2 %vm385_vm2, %v468_v24  ;;  %809 = vmatpush.bf16.msrb.mxu1 %v1185_v32 }
  0x1f   : > { %666 = vmatpush.bf16.msra.mxu3 %v1174_v46 }
  0x21   : > { %727 = vmatpush.bf16.msrb.mxu0 %v1168_v29 }
  0x22   : > { %810 = vmatpush.bf16.msrb.mxu1 %v1184_v35 }
  0x23   : > { %667 = vmatpush.bf16.msra.mxu3 %v1173_v53 }
  0x25   : > { %728 = vmatpush.bf16.msrb.mxu0 %v1167_v30 }
  0x26   : > { %811 = vmatpush.bf16.msrb.mxu1 %v1183_v40 }
  0x27   : > { %668 = vmatpush.bf16.msra.mxu3 %v1172_v55 }
  0x29   : > { %729 = vmatpush.bf16.msrb.mxu0 %v1166_v31 }
  0x2a   : > { %812 = vmatpush.bf16.msrb.mxu1 %v1182_v43  ;;  %v1219_v43 = vld [vmem:[%s1451_s6] ss:$0 sm:$0xff] }
  0x2b   : > { %669 = vmatpush.bf16.msra.mxu3 %v1171_v0 }
  0x2c   : > { %968 = vmatmul.msk.bf16.gmra.mxu0 %vm385_vm2, %v360_v27 }
  0x2d   : > { %986 = vmatmul.msk.bf16.gmra.mxu1 %vm385_vm2, %v344_v16  ;;  %730 = vmatpush.bf16.msrb.mxu0 %v1165_v34 }
  0x2e   : > { %1012 = vmatmul.msk.bf16.gmra.mxu2 %vm385_vm2, %v467_v21  ;;  %813 = vmatpush.bf16.msrb.mxu1 %v1181_v50 }
  0x2f   : > { %670 = vmatpush.bf16.msra.mxu3 %v1170_v6 }
  0x31   : > { %731 = vmatpush.bf16.msrb.mxu0 %v1164_v37 }
  0x32   : > { %814 = vmatpush.bf16.msrb.mxu1 %v1180_v54 }
  0x35   : > { %732 = vmatpush.bf16.msrb.mxu0 %v1163_v42 }
  0x36   : > { %815 = vmatpush.bf16.msrb.mxu1 %v1179_v60 }
  0x39   : > { %733 = vmatpush.bf16.msrb.mxu0 %v1162_v47 }
  0x3a   : > { %816 = vmatpush.bf16.msrb.mxu1 %v1178_v3 }
  0x99   : > { %v401_v38 = vpop.f32.mrf.mxu0 }
  0x9a   : > { %v447_v39 = vpop.f32.mrf.mxu1 }
  0x9b   : > { %v448_v44 = vadd.f32 %v447_v39, %v401_v38 }
  0xa1   : > { %v508_v45 = vpop.f32.mrf.mxu2  ;;  %v403_v48 = vpop.f32.mrf.mxu0 }
  0xa2   : > { %v449_v49 = vpop.f32.mrf.mxu1  ;;  %v517_v51 = vadd.f32 %v508_v45, %v448_v44 }
  0xa3   : > { %v450_v58 = vadd.f32 %v449_v49, %v403_v48 }
  0xa4   : > { %v524_v56 = vmul.f32 %v1216_v52, %v517_v51 }
  0xa6   : > { %v531_v1 = vadd.f32 %v1217_v57, %v524_v56 }
  0xa8   : > { %v534_v7 = vmax.f32 %v531_v1, 0.0 }
  0xa9   : > { %v510_v59 = vpop.f32.mrf.mxu2  ;;  %v406_v62 = vpop.f32.mrf.mxu0 }
  0xaa   : > { %v518_v61 = vadd.f32 %v510_v59, %v450_v58  ;;  %v452_v63 = vpop.f32.mrf.mxu1 }
  0xab   : > { %v453_v5 = vadd.f32 %v452_v63, %v406_v62 }
  0xac   : > { %v525_v2 = vmul.f32 %v1216_v52, %v518_v61 }
  0xae   : > { %v532_v4 = vadd.f32 %v1217_v57, %v525_v2 }
  0xb0   : > { %v535_v8 = vmax.f32 %v532_v4, 0.0 }
  0xb1   : > { %v513_v9 = vpop.f32.mrf.mxu2  ;;  %v408_v12 = vpop.f32.mrf.mxu0 }
  0xb2   : > { %v1189_v10 = vpack.c.bf16 %v535_v8, %v534_v7  ;;  %v519_v11 = vadd.f32 %v513_v9, %v453_v5  ;;  %v454_v13 = vpop.f32.mrf.mxu1 }
  0xb4   : > { %1190 = vst [vmem:[#allocation2] sm:$0xff] %v1189_v10   ;;  %v526_v14 = vmul.f32 %v1216_v52, %v519_v11 }
  0xb6   : > { %v533_v15 = vadd.f32 %v1217_v57, %v526_v14 }
  0xb8   : > { %v536_v16 = vmax.f32 %v533_v15, 0.0 }
  0xb9   : > { %v515_v17 = vpop.f32.mrf.mxu2 }
  0xba   : > { %v539_v18 = vpack.c.bf16 %v536_v16, %v536_v16 }
  0xbb   : > { %v550_v19 = vld [vmem:[#allocation2] sm:$0x1] }
  0xbc   : > { %v551_v20 = vsel %vm549_vm5, 0, %v550_v19  ;;  %542 = vst [vmem:[#allocation2 + $0x8] sm:$0x1] %v539_v18 }
  0xbd   : > { %552 = vst [vmem:[#allocation2] sm:$0x1] %v551_v20 }
  0xc3   : > { %v555_v21 = vld [vmem:[#allocation2 + $0x8] sm:$0x1] }
  0xc4   : > { %v556_v22 = vsel %vm554_vm7, 0, %v555_v21  ;;  %v1161_v23 = vld [vmem:[#allocation2] sm:$0xff] }
  0xc5   : > { %557 = vst [vmem:[#allocation2 + $0x8] sm:$0x1] %v556_v22  ;;  %734 = vmatmul.bf16.vlgmr.msrb.gmra.mxu0 %v1161_v23  ;;  %v605_v24 = vshll.u32 %v1161_v23, 16  ;;  %v757_v29 = vrot.slane %v1161_v23, 1  ;;  %v603_v31 = vshrl.u32 %v1161_v23, 16 }
  0xc7   : > { %v607_v28 = vrot.slane %v605_v24, 1 }
  0xc9   : > { %v608_v34 = vor.u32 %v607_v28, %v603_v31 }
  0xcc   : > { %v560_v25 = vld [vmem:[#allocation2 + $0x8] sm:$0x1] }
  0xcd   : > { %v599_v26 = vunpack.c.l.b16 %v560_v25 }
  0xcf   : > { %v601_v27 = vpack.c.b16 %v599_v26, %v599_v26 }
  0xd1   : > { %v758_v30 = vrot.slane %v601_v27, 1  ;;  %v610_v32 = vshll.u32 %v601_v27, 16 }
  0xd3   : > { %v759_v33 = vsel %vm465_vm0, %v757_v29, %v758_v30  ;;  %v612_v35 = vrot.slane %v610_v32, 1 }
  0xd4   : > { %817 = vmatmul.bf16.vlgmr.msrb.gmra.mxu1 %v759_v33 }
  0xd5   : > { %v613_v36 = vsel %vm345_vm1, %v608_v34, %v612_v35 }
  0xd6   : > { %671 = vmatmul.bf16.vlgmr.msra.gmra.mxu3 %v613_v36 }
 0x142   : > { %v735_v37 = vpop.f32.mrf.mxu0 }
 0x14a   : > { %v737_v46 = vpop.f32.mrf.mxu0 }
 0x151   : > { %v818_v38 = vpop.f32.mrf.mxu1 }
 0x159   : > { %v672_v39 = vpop.f32.mrf.mxu3  ;;  %v820_v50 = vpop.f32.mrf.mxu1 }
 0x15a   : > { %v736_v40 = vadd.f32 %v735_v37, %v672_v39 }
 0x15c   : > { %v823_v42 = vadd.f32 %v818_v38, %v736_v40 }
 0x15e   : > { %v829_v44 = vmul.f32 %v1218_v41, %v823_v42 }
 0x160   : > { %v835_v45 = vadd.f32 %v1219_v43, %v829_v44 }
 0x161   : > { %v674_v47 = vpop.f32.mrf.mxu3 }
 0x162   : > { %v837_v48 = vmax.f32 %v835_v45, 0.0  ;;  %v738_v49 = vadd.f32 %v737_v46, %v674_v47 }
 0x164   : > { %839 = vst [vmem:[%s314_s16] sm:$0xff] %v837_v48  ;;  %v824_v51 = vadd.f32 %v820_v50, %v738_v49 }
 0x166   : > { %v830_v52 = vmul.f32 %v1218_v41, %v824_v51 }
 0x168   : > { %v836_v53 = vadd.f32 %v1219_v43, %v830_v52 }
 0x16a   : > { %v838_v54 = vmax.f32 %v836_v53, 0.0 }
 0x16c   : > { %840 = vst [vmem:[%s314_s16 + $0x8] sm:$0xff] %v838_v54 }
 0x16d PF: > { %s17_s26 = sadd.s32 1, %s1242_s26   ;;  %s1453_s24 = smov %s1238_s25 }
 0x16e   : > { %p14_p5 = scmp.ge.s32.totalorder %s17_s26, 4   ;;  %s1454_s25 = smov %s1456_s27 }
 0x170   :  { %16 = sbr.rel (!%p14_p5) target bundleno = 2 (0x2), region = 86 }

// kernel: tile.23
= control target key start
LH: loop header
LB: loop body
LE: loop exit
PB: predicated region body
PF: predicated region fallthrough
CT: control target
= control target key end

     0   :  { %s28_s0 = inlined_call_operand.vmem [shape: f32[8], index: 0, kind: input, shape index: {}]   ;;  %s29_s1 = inlined_call_operand.vmem [shape: f32[16,8], index: 1, kind: output, shape index: {}]  }
   0x1   :  { %v4_v0 = vld [vmem:[%s28_s0] ss:$0 sm:$0xff] }
   0x2   :  { %5 = vst [vmem:[%s29_s1] sm:$0xff] %v4_v0 }
   0x3   :  { %8 = vst [vmem:[%s29_s1 + $0x8] sm:$0xff] %v4_v0 }

// kernel: tile.24
= control target key start
LH: loop header
LB: loop body
LE: loop exit
PB: predicated region body
PF: predicated region fallthrough
CT: control target
= control target key end

     0   :  { %s131_s10 = smov 120   ;;  %s132_s11 = smov 104   ;;  %vm3_vm0 = vcmask 64512   ;;  %vm9_vm1 = vcmask 1048512   ;;  %vm15_vm2 = vcmask 982912   ;;  %vm21_vm3 = vcmask 917312   ;;  %s207_s0 = inlined_call_operand.vmem [shape: f32[16,8], index: 0, kind: input, shape index: {}]   ;;  %s208_s1 = inlined_call_operand.vmem [shape: f32[1,128], index: 1, kind: output, shape index: {}]  }
   0x1   :  { %v101_v0 = vld [vmem:[%s207_s0 + $0xf] sm:$0x1]   ;;  %v103_v1 = vld [vmem:[%s207_s0 + $0xd] sm:$0x1]   ;;  %v105_v2 = vld [vmem:[%s207_s0 + $0xb] sm:$0x1]  }
   0x2   :  { %7 = vrot.lane.b32.xlu0 %v101_v0, %s131_s10  ;;  %19 = vrot.lane.b32.xlu1 %v103_v1, %s132_s11  ;;  %s133_s14 = smov 88   ;;  %v102_v3 = vld [vmem:[%s207_s0 + $0xe] sm:$0x1]   ;;  %v104_v4 = vld [vmem:[%s207_s0 + $0xc] sm:$0x1]   ;;  %s134_s19 = smov 112  }
   0x3   :  { %31 = vrot.lane.b32.xlu2 %v105_v2, %s133_s14  ;;  %s135_s20 = smov 96   ;;  %v106_v5 = vld [vmem:[%s207_s0 + $0xa] sm:$0x1]   ;;  %s136_s23 = smov 80   ;;  %v107_v6 = vld [vmem:[%s207_s0 + $0x9] sm:$0x1]  }
   0x4   :  { %v108_v7 = vld [vmem:[%s207_s0 + $0x8] sm:$0x1]   ;;  %s137_s28 = smov 72   ;;  %s138_s29 = smov 64   ;;  %v109_v8 = vld [vmem:[%s207_s0 + $0x7] sm:$0x1]  }
   0x5   :  { %s139_s3 = smov 56   ;;  %v110_v9 = vld [vmem:[%s207_s0 + $0x6] sm:$0x1]   ;;  %v111_v10 = vld [vmem:[%s207_s0 + $0x5] sm:$0x1]   ;;  %s140_s8 = smov 48  }
   0x6   :  { %s141_s9 = smov 40   ;;  %v112_v11 = vld [vmem:[%s207_s0 + $0x4] sm:$0x1]   ;;  %s142_s12 = smov 32   ;;  %v113_v12 = vld [vmem:[%s207_s0 + $0x3] sm:$0x1]  }
   0x7   :  { %v114_v13 = vld [vmem:[%s207_s0 + $0x2] sm:$0x1]   ;;  %s143_s17 = smov 24   ;;  %s144_s18 = smov 16   ;;  %v115_v14 = vld [vmem:[%s207_s0 + $0x1] sm:$0x1]  }
   0x8   :  { %s145_s21 = smov 8   ;;  %v2_v15 = vld [vmem:[%s207_s0] sm:$0x1]   ;;  %vm27_vm4 = vcmask 851712   ;;  %vm33_vm5 = vcmask 786112   ;;  %vm39_vm6 = vcmask 720512  }
   0x9   :  { %4 = vst.msk [vmem:[#allocation0] sm:$0x1] %vm3_vm0, %v2_v15   ;;  %vm45_vm7 = vcmask 654912   ;;  %vm51_vm8 = vcmask 589312   ;;  %vm57_vm9 = vcmask 523712   ;;  %vm63_vm10 = vcmask 458112  }
   0xa   :  { %13 = vrot.lane.b32.xlu0 %v102_v3, %s134_s19  ;;  %25 = vrot.lane.b32.xlu1 %v104_v4, %s135_s20  ;;  %vm69_vm11 = vcmask 392512   ;;  %vm75_vm12 = vcmask 326912   ;;  %vm81_vm13 = vcmask 261312   ;;  %vm87_vm14 = vcmask 195712  }
   0xb   :  { %37 = vrot.lane.b32.xlu2 %v106_v5, %s136_s23  ;;  %vm93_vm15 = vcmask 130112  }
  0x12   :  { %43 = vrot.lane.b32.xlu0 %v107_v6, %s137_s28  ;;  %49 = vrot.lane.b32.xlu1 %v108_v7, %s138_s29 }
  0x13   :  { %55 = vrot.lane.b32.xlu2 %v109_v8, %s139_s3 }
  0x1a   :  { %61 = vrot.lane.b32.xlu0 %v110_v9, %s140_s8  ;;  %67 = vrot.lane.b32.xlu1 %v111_v10, %s141_s9 }
  0x1b   :  { %73 = vrot.lane.b32.xlu2 %v112_v11, %s142_s12 }
  0x22   :  { %79 = vrot.lane.b32.xlu0 %v113_v12, %s143_s17  ;;  %85 = vrot.lane.b32.xlu1 %v114_v13, %s144_s18 }
  0x23   :  { %91 = vrot.lane.b32.xlu2 %v115_v14, %s145_s21 }
  0x5d   :  { %v32_v16 = vpop.permute.xlu2 %31  }
  0x65   :  { %v38_v17 = vpop.permute.xlu2 %37  }
  0x6d   :  { %v56_v18 = vpop.permute.xlu2 %55  }
  0x74   :  { %v8_v19 = vpop.permute.xlu0 %7   ;;  %v20_v20 = vpop.permute.xlu1 %19  }
  0x75   :  { %10 = vst.msk [vmem:[#allocation0] sm:$0x1] %vm9_vm1, %v8_v19   ;;  %v74_v21 = vpop.permute.xlu2 %73  }
  0x7c   :  { %v14_v22 = vpop.permute.xlu0 %13   ;;  %v26_v23 = vpop.permute.xlu1 %25  }
  0x7d   :  { %16 = vst.msk [vmem:[#allocation0] sm:$0x1] %vm15_vm2, %v14_v22   ;;  %v92_v24 = vpop.permute.xlu2 %91  }
  0x7e   :  { %22 = vst.msk [vmem:[#allocation0] sm:$0x1] %vm21_vm3, %v20_v20  }
  0x7f   :  { %28 = vst.msk [vmem:[#allocation0] sm:$0x1] %vm27_vm4, %v26_v23  }
  0x80   :  { %34 = vst.msk [vmem:[#allocation0] sm:$0x1] %vm33_vm5, %v32_v16  }
  0x81   :  { %40 = vst.msk [vmem:[#allocation0] sm:$0x1] %vm39_vm6, %v38_v17  }
  0x84   :  { %v44_v25 = vpop.permute.xlu0 %43   ;;  %v50_v26 = vpop.permute.xlu1 %49  }
  0x85   :  { %46 = vst.msk [vmem:[#allocation0] sm:$0x1] %vm45_vm7, %v44_v25  }
  0x86   :  { %52 = vst.msk [vmem:[#allocation0] sm:$0x1] %vm51_vm8, %v50_v26  }
  0x87   :  { %58 = vst.msk [vmem:[#allocation0] sm:$0x1] %vm57_vm9, %v56_v18  }
  0x8c   :  { %v62_v27 = vpop.permute.xlu0 %61   ;;  %v68_v28 = vpop.permute.xlu1 %67  }
  0x8d   :  { %64 = vst.msk [vmem:[#allocation0] sm:$0x1] %vm63_vm10, %v62_v27  }
  0x8e   :  { %70 = vst.msk [vmem:[#allocation0] sm:$0x1] %vm69_vm11, %v68_v28  }
  0x8f   :  { %76 = vst.msk [vmem:[#allocation0] sm:$0x1] %vm75_vm12, %v74_v21  }
  0x94   :  { %v80_v29 = vpop.permute.xlu0 %79   ;;  %v86_v30 = vpop.permute.xlu1 %85  }
  0x95   :  { %82 = vst.msk [vmem:[#allocation0] sm:$0x1] %vm81_vm13, %v80_v29  }
  0x96   :  { %88 = vst.msk [vmem:[#allocation0] sm:$0x1] %vm87_vm14, %v86_v30  }
  0x97   :  { %94 = vst.msk [vmem:[#allocation0] sm:$0x1] %vm93_vm15, %v92_v24  }
  0x9e   :  { %v97_v31 = vld [vmem:[#allocation0] sm:$0x1] }
  0x9f   :  { %100 = vst [vmem:[%s208_s1] sm:$0x1] %v97_v31 }

// kernel: _double_conv_impl.1
= control target key start
LH: loop header
LB: loop body
LE: loop exit
PB: predicated region body
PF: predicated region fallthrough
CT: control target
= control target key end

     0   :  { %s1284_s24 = smov 0   ;;  %s1286_s25 = smov 0   ;;  %s1445_s0 = inlined_call_operand.vmem [shape: bf16[2,1,20,64], index: 0, kind: input, shape index: {}]   ;;  %s1446_s1 = inlined_call_operand.vmem [shape: bf16[3,64,128], index: 1, kind: input, shape index: {}]   ;;  %s1447_s2 = inlined_call_operand.vmem [shape: f32[1,128], index: 2, kind: input, shape index: {}]   ;;  %s1448_s3 = inlined_call_operand.vmem [shape: f32[1,128], index: 3, kind: input, shape index: {}]   ;;  %s1449_s4 = inlined_call_operand.vmem [shape: bf16[3,128,128], index: 4, kind: input, shape index: {}]   ;;  %s1450_s5 = inlined_call_operand.vmem [shape: f32[1,128], index: 5, kind: input, shape index: {}]   ;;  %s1451_s6 = inlined_call_operand.vmem [shape: f32[1,128], index: 6, kind: input, shape index: {}]   ;;  %s1452_s7 = inlined_call_operand.vmem [shape: f32[2,16,128], index: 7, kind: output, shape index: {}]  }
   0x1   :  { %s1288_s26 = smov 0  }
   0x2 LB: > { %s29_s27 = sadd.s32 1, %s1238_s25  ;;  %p935_p0 = scmp.ge.s32.totalorder %s1242_s26, 1  ;;  %s1242_s26 = sphi %s1288_s26, %s17_s26   ;;  %s1238_s25 = sphi %s1286_s25, %s1454_s25   ;;  %s1234_s24 = sphi %s1284_s24, %s1453_s24  }
   0x3   : > { %p31_p1 = scmp.ge.s32.totalorder %s29_s27, 2  ;;  %p257_p2 = scmp.lt.s32.totalorder %s1242_s26, 3 }
   0x5   : > { %s1456_s27 = smov (%p31_p1, %s29_s27), 0  ;;  %p258_p3 = pnand %p935_p0, %p257_p2 }
   0x6   : > { %p297_p4 = scmp.lt.s32.totalorder (!%p258_p3), %s1234_s24, 1 }
   0x7   : > { %261 = sbr.rel (%p258_p3) target bundleno = 365 (0x16d), region = 48 }
   0xc   : > { %v1156_v0 = vld [vmem:[%s1446_s1 + $0x38] sm:$0xff]  ;;  %v1155_v3 = vld [vmem:[%s1446_s1 + $0x30] sm:$0xff]  ;;  %s1458_s24 = smov (!%p297_p4, %s1234_s24), 1  ;;  %v1154_v6 = vld [vmem:[%s1446_s1 + $0x28] sm:$0xff]  ;;  %vm465_vm0 = vcmask 1046528   ;;  %vm385_vm2 = vcmask 523264  }
   0xd   : > { %v1152_v1 = vld [vmem:[%s1446_s1 + $0x18] sm:$0xff]  ;;  %396 = vmatpush.bf16.msra.mxu0 %v1156_v0  ;;  %v1151_v4 = vld [vmem:[%s1446_s1 + $0x10] sm:$0xff]  ;;  %s1191_s17 = smul.u32 12, %s1458_s24  ;;  %v1150_v7 = vld [vmem:[%s1446_s1 + $0x8] sm:$0xff]  ;;  %vm345_vm1 = vsmask.f32 7424 }
   0xe   : > { %v1160_v2 = vld [vmem:[%s1446_s1 + $0x58] sm:$0xff]  ;;  %442 = vmatpush.bf16.msra.mxu1 %v1152_v1  ;;  %v1159_v5 = vld [vmem:[%s1446_s1 + $0x50] sm:$0xff]  ;;  %v1158_v8 = vld [vmem:[%s1446_s1 + $0x48] sm:$0xff]  ;;  %vm547_vm3 = vcmask 1040384   ;;  %vm548_vm4 = vsmask.f32 256 }
   0xf   : > { %503 = vmatpush.bf16.msra.mxu2 %v1160_v2  ;;  %s305_s28 = scalar_lea.vmem %s1445_s0, %s1191_s17  ;;  %v1153_v14 = vld [vmem:[%s1446_s1 + $0x20] sm:$0xff]  ;;  %v1169_v28 = vld [vmem:[%s1449_s4 + $0x38] sm:$0xff]  ;;  %v1168_v29 = vld [vmem:[%s1449_s4 + $0x30] sm:$0xff]  ;;  %vm553_vm6 = vsmask.f32 7938  ;;  %s1147_s13 = sshll.u32 %s1458_s24, 4 }
  0x10   : > { %v1148_v9 = vld [vmem:[%s305_s28] sm:$0xff]  ;;  %v319_v10 = vld [vmem:[%s305_s28 + $0x8] sm:$0x3]  ;;  %v1185_v32 = vld [vmem:[%s1449_s4 + $0xb8] sm:$0xff]  ;;  %s314_s16 = scalar_lea.vmem %s1452_s7, %s1147_s13 }
  0x11   : > { %397 = vmatpush.bf16.msra.mxu0 %v1155_v3  ;;  %v342_v11 = vunpack.c.l.b16 %v319_v10  ;;  %v347_v12 = vshrl.u32 %v1148_v9, 16  ;;  %v349_v13 = vshll.u32 %v1148_v9, 16  ;;  %v1149_v15 = vld [vmem:[%s1446_s1] sm:$0xff]  ;;  %v466_v19 = vrot.slane %v1148_v9, 1  ;;  %v1167_v30 = vld [vmem:[%s1449_s4 + $0x28] sm:$0xff]  ;;  %v1177_v33 = vld [vmem:[%s1449_s4 + $0x78] sm:$0xff] }
  0x12   : > { %443 = vmatpush.bf16.msra.mxu1 %v1151_v4  ;;  %v1157_v17 = vld [vmem:[%s1446_s1 + $0x40] sm:$0xff]  ;;  %v1165_v34 = vld [vmem:[%s1449_s4 + $0x18] sm:$0xff]  ;;  %663 = vmatpush.bf16.msra.mxu3 %v1177_v33  ;;  %v1184_v35 = vld [vmem:[%s1449_s4 + $0xb0] sm:$0xff] }
  0x13   : > { %504 = vmatpush.bf16.msra.mxu2 %v1159_v5  ;;  %v344_v16 = vpack.c.b16 %v342_v11, %v342_v11  ;;  %v351_v18 = vrot.slane %v349_v13, 1  ;;  %v1166_v31 = vld [vmem:[%s1449_s4 + $0x20] sm:$0xff]  ;;  %v1176_v36 = vld [vmem:[%s1449_s4 + $0x70] sm:$0xff]  ;;  %v1183_v40 = vld [vmem:[%s1449_s4 + $0xa8] sm:$0xff] }
  0x14   : > { %v1164_v37 = vld [vmem:[%s1449_s4 + $0x10] sm:$0xff]  ;;  %v1175_v41 = vld [vmem:[%s1449_s4 + $0x68] sm:$0xff]  ;;  %v1182_v43 = vld [vmem:[%s1449_s4 + $0xa0] sm:$0xff] }
  0x15   : > { %398 = vmatpush.bf16.msra.mxu0 %v1154_v6  ;;  %v354_v20 = vshll.u32 %v344_v16, 16  ;;  %v467_v21 = vrot.slane %v344_v16, 1  ;;  %v352_v22 = vor.u32 %v351_v18, %v347_v12  ;;  %v358_v26 = vshrl.u32 %v344_v16, 16  ;;  %v1163_v42 = vld [vmem:[%s1449_s4 + $0x8] sm:$0xff]  ;;  %v1174_v46 = vld [vmem:[%s1449_s4 + $0x60] sm:$0xff]  ;;  %v1181_v50 = vld [vmem:[%s1449_s4 + $0x98] sm:$0xff] }
  0x16   : > { %444 = vmatpush.bf16.msra.mxu1 %v1150_v7  ;;  %664 = vmatpush.bf16.msra.mxu3 %v1176_v36  ;;  %v1162_v47 = vld [vmem:[%s1449_s4] sm:$0xff]  ;;  %v1173_v53 = vld [vmem:[%s1449_s4 + $0x58] sm:$0xff]  ;;  %v1180_v54 = vld [vmem:[%s1449_s4 + $0x90] sm:$0xff] }
  0x17   : > { %505 = vmatpush.bf16.msra.mxu2 %v1158_v8  ;;  %v356_v23 = vrot.slane %v354_v20, 1  ;;  %v468_v24 = vsel %vm465_vm0, %v466_v19, %v467_v21  ;;  %v1216_v52 = vld [vmem:[%s1447_s2] ss:$0 sm:$0xff]  ;;  %v1172_v55 = vld [vmem:[%s1449_s4 + $0x50] sm:$0xff]  ;;  %v1179_v60 = vld [vmem:[%s1449_s4 + $0x88] sm:$0xff] }
  0x18   : > { %v1217_v57 = vld [vmem:[%s1448_s3] ss:$0 sm:$0xff]  ;;  %v1171_v0 = vld [vmem:[%s1449_s4 + $0x48] sm:$0xff]  ;;  %vm549_vm5 = vmand %vm547_vm3, %vm548_vm4 }
  0x19   : > { %399 = vmatpush.bf16.msra.mxu0 %v1153_v14  ;;  %v357_v25 = vsel %vm345_vm1, %v352_v22, %v356_v23  ;;  %v360_v27 = vor.u32 %v358_v26, %v356_v23  ;;  %v1178_v3 = vld [vmem:[%s1449_s4 + $0x80] sm:$0xff]  ;;  %vm554_vm7 = vmand %vm547_vm3, %vm553_vm6 }
  0x1a   : > { %445 = vmatpush.bf16.msra.mxu1 %v1149_v15  ;;  %665 = vmatpush.bf16.msra.mxu3 %v1175_v41  ;;  %v1170_v6 = vld [vmem:[%s1449_s4 + $0x40] sm:$0xff] }
  0x1b   : > { %506 = vmatpush.bf16.msra.mxu2 %v1157_v17  ;;  %v1218_v41 = vld [vmem:[%s1450_s5] ss:$0 sm:$0xff] }
  0x1c   : > { %967 = vmatmul.msk.bf16.vlgmr.msra.gmra.mxu0 %vm385_vm2, %v357_v25 }
  0x1d   : > { %985 = vmatmul.msk.bf16.vlgmr.msra.gmra.mxu1 %vm385_vm2, %v1148_v9  ;;  %726 = vmatpush.bf16.msrb.mxu0 %v1169_v28 }
  0x1e   : > { %1011 = vmatmul.msk.bf16.vlgmr.msra.gmra.mxu2 %vm385_vm2, %v468_v24  ;;  %809 = vmatpush.bf16.msrb.mxu1 %v1185_v32 }
  0x1f   : > { %666 = vmatpush.bf16.msra.mxu3 %v1174_v46 }
  0x21   : > { %727 = vmatpush.bf16.msrb.mxu0 %v1168_v29 }
  0x22   : > { %810 = vmatpush.bf16.msrb.mxu1 %v1184_v35 }
  0x23   : > { %667 = vmatpush.bf16.msra.mxu3 %v1173_v53 }
  0x25   : > { %728 = vmatpush.bf16.msrb.mxu0 %v1167_v30 }
  0x26   : > { %811 = vmatpush.bf16.msrb.mxu1 %v1183_v40 }
  0x27   : > { %668 = vmatpush.bf16.msra.mxu3 %v1172_v55 }
  0x29   : > { %729 = vmatpush.bf16.msrb.mxu0 %v1166_v31 }
  0x2a   : > { %812 = vmatpush.bf16.msrb.mxu1 %v1182_v43  ;;  %v1219_v43 = vld [vmem:[%s1451_s6] ss:$0 sm:$0xff] }
  0x2b   : > { %669 = vmatpush.bf16.msra.mxu3 %v1171_v0 }
  0x2c   : > { %968 = vmatmul.msk.bf16.gmra.mxu0 %vm385_vm2, %v360_v27 }
  0x2d   : > { %986 = vmatmul.msk.bf16.gmra.mxu1 %vm385_vm2, %v344_v16  ;;  %730 = vmatpush.bf16.msrb.mxu0 %v1165_v34 }
  0x2e   : > { %1012 = vmatmul.msk.bf16.gmra.mxu2 %vm385_vm2, %v467_v21  ;;  %813 = vmatpush.bf16.msrb.mxu1 %v1181_v50 }
  0x2f   : > { %670 = vmatpush.bf16.msra.mxu3 %v1170_v6 }
  0x31   : > { %731 = vmatpush.bf16.msrb.mxu0 %v1164_v37 }
  0x32   : > { %814 = vmatpush.bf16.msrb.mxu1 %v1180_v54 }
  0x35   : > { %732 = vmatpush.bf16.msrb.mxu0 %v1163_v42 }
  0x36   : > { %815 = vmatpush.bf16.msrb.mxu1 %v1179_v60 }
  0x39   : > { %733 = vmatpush.bf16.msrb.mxu0 %v1162_v47 }
  0x3a   : > { %816 = vmatpush.bf16.msrb.mxu1 %v1178_v3 }
  0x99   : > { %v401_v38 = vpop.f32.mrf.mxu0 }
  0x9a   : > { %v447_v39 = vpop.f32.mrf.mxu1 }
  0x9b   : > { %v448_v44 = vadd.f32 %v447_v39, %v401_v38 }
  0xa1   : > { %v508_v45 = vpop.f32.mrf.mxu2  ;;  %v403_v48 = vpop.f32.mrf.mxu0 }
  0xa2   : > { %v449_v49 = vpop.f32.mrf.mxu1  ;;  %v517_v51 = vadd.f32 %v508_v45, %v448_v44 }
  0xa3   : > { %v450_v58 = vadd.f32 %v449_v49, %v403_v48 }
  0xa4   : > { %v524_v56 = vmul.f32 %v1216_v52, %v517_v51 }
  0xa6   : > { %v531_v1 = vadd.f32 %v1217_v57, %v524_v56 }
  0xa8   : > { %v534_v7 = vmax.f32 %v531_v1, 0.0 }
  0xa9   : > { %v510_v59 = vpop.f32.mrf.mxu2  ;;  %v406_v62 = vpop.f32.mrf.mxu0 }
  0xaa   : > { %v518_v61 = vadd.f32 %v510_v59, %v450_v58  ;;  %v452_v63 = vpop.f32.mrf.mxu1 }
  0xab   : > { %v453_v5 = vadd.f32 %v452_v63, %v406_v62 }
  0xac   : > { %v525_v2 = vmul.f32 %v1216_v52, %v518_v61 }
  0xae   : > { %v532_v4 = vadd.f32 %v1217_v57, %v525_v2 }
  0xb0   : > { %v535_v8 = vmax.f32 %v532_v4, 0.0 }
  0xb1   : > { %v513_v9 = vpop.f32.mrf.mxu2  ;;  %v408_v12 = vpop.f32.mrf.mxu0 }
  0xb2   : > { %v1189_v10 = vpack.c.bf16 %v535_v8, %v534_v7  ;;  %v519_v11 = vadd.f32 %v513_v9, %v453_v5  ;;  %v454_v13 = vpop.f32.mrf.mxu1 }
  0xb4   : > { %1190 = vst [vmem:[#allocation2] sm:$0xff] %v1189_v10   ;;  %v526_v14 = vmul.f32 %v1216_v52, %v519_v11 }
  0xb6   : > { %v533_v15 = vadd.f32 %v1217_v57, %v526_v14 }
  0xb8   : > { %v536_v16 = vmax.f32 %v533_v15, 0.0 }
  0xb9   : > { %v515_v17 = vpop.f32.mrf.mxu2 }
  0xba   : > { %v539_v18 = vpack.c.bf16 %v536_v16, %v536_v16 }
  0xbb   : > { %v550_v19 = vld [vmem:[#allocation2] sm:$0x1] }
  0xbc   : > { %v551_v20 = vsel %vm549_vm5, 0, %v550_v19  ;;  %542 = vst [vmem:[#allocation2 + $0x8] sm:$0x1] %v539_v18 }
  0xbd   : > { %552 = vst [vmem:[#allocation2] sm:$0x1] %v551_v20 }
  0xc3   : > { %v555_v21 = vld [vmem:[#allocation2 + $0x8] sm:$0x1] }
  0xc4   : > { %v556_v22 = vsel %vm554_vm7, 0, %v555_v21  ;;  %v1161_v23 = vld [vmem:[#allocation2] sm:$0xff] }
  0xc5   : > { %557 = vst [vmem:[#allocation2 + $0x8] sm:$0x1] %v556_v22  ;;  %734 = vmatmul.bf16.vlgmr.msrb.gmra.mxu0 %v1161_v23  ;;  %v605_v24 = vshll.u32 %v1161_v23, 16  ;;  %v757_v29 = vrot.slane %v1161_v23, 1  ;;  %v603_v31 = vshrl.u32 %v1161_v23, 16 }
  0xc7   : > { %v607_v28 = vrot.slane %v605_v24, 1 }
  0xc9   : > { %v608_v34 = vor.u32 %v607_v28, %v603_v31 }
  0xcc   : > { %v560_v25 = vld [vmem:[#allocation2 + $0x8] sm:$0x1] }
  0xcd   : > { %v599_v26 = vunpack.c.l.b16 %v560_v25 }
  0xcf   : > { %v601_v27 = vpack.c.b16 %v599_v26, %v599_v26 }
  0xd1   : > { %v758_v30 = vrot.slane %v601_v27, 1  ;;  %v610_v32 = vshll.u32 %v601_v27, 16 }
  0xd3   : > { %v759_v33 = vsel %vm465_vm0, %v757_v29, %v758_v30  ;;  %v612_v35 = vrot.slane %v610_v32, 1 }
  0xd4   : > { %817 = vmatmul.bf16.vlgmr.msrb.gmra.mxu1 %v759_v33 }
  0xd5   : > { %v613_v36 = vsel %vm345_vm1, %v608_v34, %v612_v35 }
  0xd6   : > { %671 = vmatmul.bf16.vlgmr.msra.gmra.mxu3 %v613_v36 }
 0x142   : > { %v735_v37 = vpop.f32.mrf.mxu0 }
 0x14a   : > { %v737_v46 = vpop.f32.mrf.mxu0 }
 0x151   : > { %v818_v38 = vpop.f32.mrf.mxu1 }
 0x159   : > { %v672_v39 = vpop.f32.mrf.mxu3  ;;  %v820_v50 = vpop.f32.mrf.mxu1 }
 0x15a   : > { %v736_v40 = vadd.f32 %v735_v37, %v672_v39 }
 0x15c   : > { %v823_v42 = vadd.f32 %v818_v38, %v736_v40 }
 0x15e   : > { %v829_v44 = vmul.f32 %v1218_v41, %v823_v42 }
 0x160   : > { %v835_v45 = vadd.f32 %v1219_v43, %v829_v44 }
 0x161   : > { %v674_v47 = vpop.f32.mrf.mxu3 }
 0x162   : > { %v837_v48 = vmax.f32 %v835_v45, 0.0  ;;  %v738_v49 = vadd.f32 %v737_v46, %v674_v47 }
 0x164   : > { %839 = vst [vmem:[%s314_s16] sm:$0xff] %v837_v48  ;;  %v824_v51 = vadd.f32 %v820_v50, %v738_v49 }
 0x166   : > { %v830_v52 = vmul.f32 %v1218_v41, %v824_v51 }
 0x168   : > { %v836_v53 = vadd.f32 %v1219_v43, %v830_v52 }
 0x16a   : > { %v838_v54 = vmax.f32 %v836_v53, 0.0 }
 0x16c   : > { %840 = vst [vmem:[%s314_s16 + $0x8] sm:$0xff] %v838_v54 }
 0x16d PF: > { %s17_s26 = sadd.s32 1, %s1242_s26   ;;  %s1453_s24 = smov %s1238_s25 }
 0x16e   : > { %p14_p5 = scmp.ge.s32.totalorder %s17_s26, 4   ;;  %s1454_s25 = smov %s1456_s27 }
 0x170   :  { %16 = sbr.rel (!%p14_p5) target bundleno = 2 (0x2), region = 86 }

</bundles_post_ra>
